<compile_context>
chip_gen: v5e
topology: v5e:2x2
jax: 0.10.0
libtpu: 0.0.40
codegen_flags: <defaults>
</compile_context>

<pallas_src>
import math

import jax
import jax.numpy as jnp
from jax.experimental import pallas as pl
from jax.experimental.pallas import tpu as pltpu


def _lstm_kernel(x_ref, w_ih_ref, w_hh_ref, b_ref, out_ref, cn_ref):
    """Single-invocation LSTM.

    x_ref:    (T*B, I)   time-major flattened input, VMEM resident
    w_ih_ref: (4, I, H)  per-gate input weights (PyTorch gate order i, f, g, o)
    w_hh_ref: (4, H, H)  per-gate hidden weights
    b_ref:    (4, 1, H)  per-gate combined bias (b_ih + b_hh)
    out_ref:  (T, B, H)  time-major hidden states (written once as a slab)
    cn_ref:   (B, H)     final cell state
    """
    T, B, H = out_ref.shape
    x_flat = x_ref[...]                                   # (T*B, I)

    # ---- Hoisted input projections: one batched matmul per gate. ----
    xi = jnp.dot(x_flat, w_ih_ref[0], preferred_element_type=jnp.float32) + b_ref[0]
    xf = jnp.dot(x_flat, w_ih_ref[1], preferred_element_type=jnp.float32) + b_ref[1]
    xg = jnp.dot(x_flat, w_ih_ref[2], preferred_element_type=jnp.float32) + b_ref[2]
    xo = jnp.dot(x_flat, w_ih_ref[3], preferred_element_type=jnp.float32) + b_ref[3]

    w_i = w_hh_ref[0]
    w_f = w_hh_ref[1]
    w_g = w_hh_ref[2]
    w_o = w_hh_ref[3]

    # ---- Serial recurrence, fully unrolled (T is a small static constant).
    # Initial (h, c) are zeros, matching torch's default when no state is given.
    h = jnp.zeros((B, H), jnp.float32)
    c = jnp.zeros((B, H), jnp.float32)
    for t in range(T):
        r0, r1 = t * B, (t + 1) * B
        i_t = jax.nn.sigmoid(
            xi[r0:r1] + jnp.dot(h, w_i, preferred_element_type=jnp.float32))
        f_t = jax.nn.sigmoid(
            xf[r0:r1] + jnp.dot(h, w_f, preferred_element_type=jnp.float32))
        g_t = jnp.tanh(
            xg[r0:r1] + jnp.dot(h, w_g, preferred_element_type=jnp.float32))
        o_t = jax.nn.sigmoid(
            xo[r0:r1] + jnp.dot(h, w_o, preferred_element_type=jnp.float32))
        c = f_t * c + i_t * g_t
        h = o_t * jnp.tanh(c)
        out_ref[t] = h                                   # VMEM store; HBM writeback once

    cn_ref[...] = c


def lstm_forward_pallas(x, w_ih, w_hh, b_ih, b_hh):
    """x: (B, T, I) batch_first float32.

    Returns (r_out (B, T, H), h_n (1, B, H), c_n (1, B, H)) like nn.LSTM.
    """
    B, T, I = x.shape
    H = w_ih.shape[0] // 4

    # Time-major, flattened to (T*B, I) so the input projection is one batched
    # matmul per gate inside the kernel.
    x_tm_flat = jnp.transpose(x, (1, 0, 2)).reshape(T * B, I).astype(jnp.float32)

    # Per-gate weight layout (PyTorch gate order [i, f, g, o]).
    b = (b_ih + b_hh).astype(jnp.float32)
    w_ih_g = jnp.stack(
        [w_ih[g * H:(g + 1) * H, :].T for g in range(4)], axis=0).astype(jnp.float32)  # (4, I, H)
    w_hh_g = jnp.stack(
        [w_hh[g * H:(g + 1) * H, :].T for g in range(4)], axis=0).astype(jnp.float32)  # (4, H, H)
    b_g = jnp.stack(
        [b[g * H:(g + 1) * H].reshape(1, H) for g in range(4)], axis=0)                # (4, 1, H)

    vmem_spec = pl.BlockSpec(memory_space=pltpu.MemorySpace.VMEM)

    out_tm, c_n = pl.pallas_call(
        _lstm_kernel,
        out_shape=(
            jax.ShapeDtypeStruct((T, B, H), jnp.float32),
            jax.ShapeDtypeStruct((B, H), jnp.float32),
        ),
        in_specs=[vmem_spec, vmem_spec, vmem_spec, vmem_spec],
        out_specs=(vmem_spec, vmem_spec),
    )(x_tm_flat, w_ih_g, w_hh_g, b_g)

    r_out = jnp.transpose(out_tm, (1, 0, 2))   # (B, T, H) batch_first
    h_n = out_tm[T - 1]                        # last hidden state == r_out[:, -1, :]
    return r_out, h_n[None, ...], c_n[None, ...]


def lstm_forward_ref(x, w_ih, w_hh, b_ih, b_hh):
    """Pure-JAX reference (lax.scan), mirrors PyTorch nn.LSTM math."""
    B, T, I = x.shape
    H = w_ih.shape[0] // 4
    b = b_ih + b_hh

    def step(carry, x_t):
        h, c = carry
        gates = x_t @ w_ih.T + h @ w_hh.T + b
        i = jax.nn.sigmoid(gates[:, 0 * H:1 * H])
        f = jax.nn.sigmoid(gates[:, 1 * H:2 * H])
        g = jnp.tanh(gates[:, 2 * H:3 * H])
        o = jax.nn.sigmoid(gates[:, 3 * H:4 * H])
        c_new = f * c + i * g
        h_new = o * jnp.tanh(c_new)
        return (h_new, c_new), h_new

    h0 = jnp.zeros((B, H), jnp.float32)
    c0 = jnp.zeros((B, H), jnp.float32)
    (h_n, c_n), outs = jax.lax.scan(step, (h0, c0), jnp.transpose(x, (1, 0, 2)))
    return jnp.transpose(outs, (1, 0, 2)), h_n[None], c_n[None]


class RNN:
    """Mirror of the PyTorch RNN module (single-layer LSTM, batch_first)."""

    def __init__(self, input_size=4, hidden_size=20, key=jax.random.PRNGKey(1234)):
        self.input_size = input_size
        self.hidden_size = hidden_size
        k = 1.0 / math.sqrt(hidden_size)
        ks = jax.random.split(key, 4)
        # Same shapes / init distribution as torch nn.LSTM (uniform(-k, k)).
        self.w_ih = jax.random.uniform(ks[0], (4 * hidden_size, input_size),
                                       jnp.float32, -k, k)
        self.w_hh = jax.random.uniform(ks[1], (4 * hidden_size, hidden_size),
                                       jnp.float32, -k, k)
        self.b_ih = jax.random.uniform(ks[2], (4 * hidden_size,), jnp.float32, -k, k)
        self.b_hh = jax.random.uniform(ks[3], (4 * hidden_size,), jnp.float32, -k, k)

    def forward(self, x, h_n, h_c):
        # Note: the PyTorch module ignores the passed-in (h_n, h_c) — it calls
        # self.rnn(x) with default zero initial states. We reproduce that.
        del h_n, h_c
        r_out, h_n_new, c_n_new = lstm_forward_pallas(
            x, self.w_ih, self.w_hh, self.b_ih, self.b_hh)
        return r_out, h_n_new, c_n_new

    __call__ = forward


# TODO(synk): the surrounding Net (conv/bn residual stack, pack_padded_sequence
# ragged-batch handling, fc_extra head) is left to standard XLA; only the LSTM
# recurrence (the RNN submodule) is implemented as a Pallas kernel here.


if __name__ == "__main__":
    B, T, I, H = 2, 8, 4, 20

    key = jax.random.PRNGKey(0)
    kx, kh, kc, kp = jax.random.split(key, 4)
    x = jax.random.normal(kx, (B, T, I), jnp.float32)
    h_n_in = jax.random.normal(kh, (1, B, H), jnp.float32)   # ignored (like PyTorch)
    h_c_in = jax.random.normal(kc, (1, B, H), jnp.float32)   # ignored (like PyTorch)

    model = RNN(input_size=I, hidden_size=H, key=kp)

    r_out, h_n, c_n = model(x, h_n_in, h_c_in)
    jax.block_until_ready((r_out, h_n, c_n))

    # Verify against pure-JAX reference.
    r_ref, h_ref, c_ref = lstm_forward_ref(
        x, model.w_ih, model.w_hh, model.b_ih, model.b_hh)
    assert r_out.shape == (B, T, H) and h_n.shape == (1, B, H) and c_n.shape == (1, B, H)
    assert jnp.allclose(r_out, r_ref, atol=1e-5, rtol=1e-5)
    assert jnp.allclose(h_n, h_ref, atol=1e-5, rtol=1e-5)
    assert jnp.allclose(c_n, c_ref, atol=1e-5, rtol=1e-5)

    print("KERNEL_OK")
</pallas_src>

<mosaic_0001>
module attributes {stable_mosaic.version = 11 : i64} {
  func.func @_lstm_kernel(%arg0: memref<16x4xf32, #tpu.memory_space<vmem>>, %arg1: memref<4x4x20xf32, #tpu.memory_space<vmem>>, %arg2: memref<4x20x20xf32, #tpu.memory_space<vmem>>, %arg3: memref<4x1x20xf32, #tpu.memory_space<vmem>>, %arg4: memref<8x2x20xf32, #tpu.memory_space<vmem>>, %arg5: memref<2x20xf32, #tpu.memory_space<vmem>>) attributes {dimension_semantics = [], scalar_prefetch = 0 : i64, scratch_operands = 0 : i64, tpu.core_type = #tpu.core_type<tc>} {
    %c0 = arith.constant 0 : index
    %c0_0 = arith.constant 0 : index
    %0 = vector.load %arg0[%c0, %c0_0] : memref<16x4xf32, #tpu.memory_space<vmem>>, vector<16x4xf32>
    %c0_1 = arith.constant 0 : index
    %c0_2 = arith.constant 0 : index
    %c0_3 = arith.constant 0 : index
    %1 = vector.load %arg1[%c0_1, %c0_2, %c0_3] : memref<4x4x20xf32, #tpu.memory_space<vmem>>, vector<1x4x20xf32>
    %2 = vector.shape_cast %1 : vector<1x4x20xf32> to vector<4x20xf32>
    %cst = arith.constant dense<0.000000e+00> : vector<16x20xf32>
    %3 = tpu.matmul %0, %2, %cst {dimension_numbers = #tpu.dot_dimension_numbers<[1], [0], [0], [1], [0, 0, 1, 1], [], []>} : vector<16x4xf32>, vector<4x20xf32>, vector<16x20xf32> -> vector<16x20xf32>
    %c0_4 = arith.constant 0 : index
    %c0_5 = arith.constant 0 : index
    %c0_6 = arith.constant 0 : index
    %4 = vector.load %arg3[%c0_4, %c0_5, %c0_6] : memref<4x1x20xf32, #tpu.memory_space<vmem>>, vector<1x1x20xf32>
    %5 = vector.shape_cast %4 : vector<1x1x20xf32> to vector<1x20xf32>
    %6 = vector.broadcast %5 : vector<1x20xf32> to vector<16x20xf32>
    %7 = arith.addf %3, %6 : vector<16x20xf32>
    %c1 = arith.constant 1 : index
    %c0_7 = arith.constant 0 : index
    %c0_8 = arith.constant 0 : index
    %8 = vector.load %arg1[%c1, %c0_7, %c0_8] : memref<4x4x20xf32, #tpu.memory_space<vmem>>, vector<1x4x20xf32>
    %9 = vector.shape_cast %8 : vector<1x4x20xf32> to vector<4x20xf32>
    %cst_9 = arith.constant dense<0.000000e+00> : vector<16x20xf32>
    %10 = tpu.matmul %0, %9, %cst_9 {dimension_numbers = #tpu.dot_dimension_numbers<[1], [0], [0], [1], [0, 0, 1, 1], [], []>} : vector<16x4xf32>, vector<4x20xf32>, vector<16x20xf32> -> vector<16x20xf32>
    %c1_10 = arith.constant 1 : index
    %c0_11 = arith.constant 0 : index
    %c0_12 = arith.constant 0 : index
    %11 = vector.load %arg3[%c1_10, %c0_11, %c0_12] : memref<4x1x20xf32, #tpu.memory_space<vmem>>, vector<1x1x20xf32>
    %12 = vector.shape_cast %11 : vector<1x1x20xf32> to vector<1x20xf32>
    %13 = vector.broadcast %12 : vector<1x20xf32> to vector<16x20xf32>
    %14 = arith.addf %10, %13 : vector<16x20xf32>
    %c2 = arith.constant 2 : index
    %c0_13 = arith.constant 0 : index
    %c0_14 = arith.constant 0 : index
    %15 = vector.load %arg1[%c2, %c0_13, %c0_14] : memref<4x4x20xf32, #tpu.memory_space<vmem>>, vector<1x4x20xf32>
    %16 = vector.shape_cast %15 : vector<1x4x20xf32> to vector<4x20xf32>
    %cst_15 = arith.constant dense<0.000000e+00> : vector<16x20xf32>
    %17 = tpu.matmul %0, %16, %cst_15 {dimension_numbers = #tpu.dot_dimension_numbers<[1], [0], [0], [1], [0, 0, 1, 1], [], []>} : vector<16x4xf32>, vector<4x20xf32>, vector<16x20xf32> -> vector<16x20xf32>
    %c2_16 = arith.constant 2 : index
    %c0_17 = arith.constant 0 : index
    %c0_18 = arith.constant 0 : index
    %18 = vector.load %arg3[%c2_16, %c0_17, %c0_18] : memref<4x1x20xf32, #tpu.memory_space<vmem>>, vector<1x1x20xf32>
    %19 = vector.shape_cast %18 : vector<1x1x20xf32> to vector<1x20xf32>
    %20 = vector.broadcast %19 : vector<1x20xf32> to vector<16x20xf32>
    %21 = arith.addf %17, %20 : vector<16x20xf32>
    %c3 = arith.constant 3 : index
    %c0_19 = arith.constant 0 : index
    %c0_20 = arith.constant 0 : index
    %22 = vector.load %arg1[%c3, %c0_19, %c0_20] : memref<4x4x20xf32, #tpu.memory_space<vmem>>, vector<1x4x20xf32>
    %23 = vector.shape_cast %22 : vector<1x4x20xf32> to vector<4x20xf32>
    %cst_21 = arith.constant dense<0.000000e+00> : vector<16x20xf32>
    %24 = tpu.matmul %0, %23, %cst_21 {dimension_numbers = #tpu.dot_dimension_numbers<[1], [0], [0], [1], [0, 0, 1, 1], [], []>} : vector<16x4xf32>, vector<4x20xf32>, vector<16x20xf32> -> vector<16x20xf32>
    %c3_22 = arith.constant 3 : index
    %c0_23 = arith.constant 0 : index
    %c0_24 = arith.constant 0 : index
    %25 = vector.load %arg3[%c3_22, %c0_23, %c0_24] : memref<4x1x20xf32, #tpu.memory_space<vmem>>, vector<1x1x20xf32>
    %26 = vector.shape_cast %25 : vector<1x1x20xf32> to vector<1x20xf32>
    %27 = vector.broadcast %26 : vector<1x20xf32> to vector<16x20xf32>
    %28 = arith.addf %24, %27 : vector<16x20xf32>
    %c0_25 = arith.constant 0 : index
    %c0_26 = arith.constant 0 : index
    %c0_27 = arith.constant 0 : index
    %29 = vector.load %arg2[%c0_25, %c0_26, %c0_27] : memref<4x20x20xf32, #tpu.memory_space<vmem>>, vector<1x20x20xf32>
    %30 = vector.shape_cast %29 : vector<1x20x20xf32> to vector<20x20xf32>
    %c1_28 = arith.constant 1 : index
    %c0_29 = arith.constant 0 : index
    %c0_30 = arith.constant 0 : index
    %31 = vector.load %arg2[%c1_28, %c0_29, %c0_30] : memref<4x20x20xf32, #tpu.memory_space<vmem>>, vector<1x20x20xf32>
    %32 = vector.shape_cast %31 : vector<1x20x20xf32> to vector<20x20xf32>
    %c2_31 = arith.constant 2 : index
    %c0_32 = arith.constant 0 : index
    %c0_33 = arith.constant 0 : index
    %33 = vector.load %arg2[%c2_31, %c0_32, %c0_33] : memref<4x20x20xf32, #tpu.memory_space<vmem>>, vector<1x20x20xf32>
    %34 = vector.shape_cast %33 : vector<1x20x20xf32> to vector<20x20xf32>
    %c3_34 = arith.constant 3 : index
    %c0_35 = arith.constant 0 : index
    %c0_36 = arith.constant 0 : index
    %35 = vector.load %arg2[%c3_34, %c0_35, %c0_36] : memref<4x20x20xf32, #tpu.memory_space<vmem>>, vector<1x20x20xf32>
    %36 = vector.shape_cast %35 : vector<1x20x20xf32> to vector<20x20xf32>
    %cst_37 = arith.constant 0.000000e+00 : f32
    %37 = vector.broadcast %cst_37 : f32 to vector<2x20xf32>
    %cst_38 = arith.constant 0.000000e+00 : f32
    %38 = vector.broadcast %cst_38 : f32 to vector<2x20xf32>
    %39 = vector.extract_strided_slice %7 {offsets = [0, 0], sizes = [2, 20], strides = [1, 1]} : vector<16x20xf32> to vector<2x20xf32>
    %cst_39 = arith.constant dense<0.000000e+00> : vector<2x20xf32>
    %40 = tpu.matmul %37, %30, %cst_39 {dimension_numbers = #tpu.dot_dimension_numbers<[1], [0], [0], [1], [0, 0, 1, 1], [], []>} : vector<2x20xf32>, vector<20x20xf32>, vector<2x20xf32> -> vector<2x20xf32>
    %41 = arith.addf %39, %40 : vector<2x20xf32>
    %42 = arith.negf %41 : vector<2x20xf32>
    %43 = math.exp %42 : vector<2x20xf32>
    %cst_40 = arith.constant 1.000000e+00 : f32
    %44 = vector.broadcast %cst_40 : f32 to vector<2x20xf32>
    %45 = arith.addf %44, %43 : vector<2x20xf32>
    %46 = arith.divf %44, %45 : vector<2x20xf32>
    %47 = vector.extract_strided_slice %14 {offsets = [0, 0], sizes = [2, 20], strides = [1, 1]} : vector<16x20xf32> to vector<2x20xf32>
    %cst_41 = arith.constant dense<0.000000e+00> : vector<2x20xf32>
    %48 = tpu.matmul %37, %32, %cst_41 {dimension_numbers = #tpu.dot_dimension_numbers<[1], [0], [0], [1], [0, 0, 1, 1], [], []>} : vector<2x20xf32>, vector<20x20xf32>, vector<2x20xf32> -> vector<2x20xf32>
    %49 = arith.addf %47, %48 : vector<2x20xf32>
    %50 = arith.negf %49 : vector<2x20xf32>
    %51 = math.exp %50 : vector<2x20xf32>
    %cst_42 = arith.constant 1.000000e+00 : f32
    %52 = vector.broadcast %cst_42 : f32 to vector<2x20xf32>
    %53 = arith.addf %52, %51 : vector<2x20xf32>
    %54 = arith.divf %52, %53 : vector<2x20xf32>
    %55 = vector.extract_strided_slice %21 {offsets = [0, 0], sizes = [2, 20], strides = [1, 1]} : vector<16x20xf32> to vector<2x20xf32>
    %cst_43 = arith.constant dense<0.000000e+00> : vector<2x20xf32>
    %56 = tpu.matmul %37, %34, %cst_43 {dimension_numbers = #tpu.dot_dimension_numbers<[1], [0], [0], [1], [0, 0, 1, 1], [], []>} : vector<2x20xf32>, vector<20x20xf32>, vector<2x20xf32> -> vector<2x20xf32>
    %57 = arith.addf %55, %56 : vector<2x20xf32>
    %58 = math.tanh %57 : vector<2x20xf32>
    %59 = vector.extract_strided_slice %28 {offsets = [0, 0], sizes = [2, 20], strides = [1, 1]} : vector<16x20xf32> to vector<2x20xf32>
    %cst_44 = arith.constant dense<0.000000e+00> : vector<2x20xf32>
    %60 = tpu.matmul %37, %36, %cst_44 {dimension_numbers = #tpu.dot_dimension_numbers<[1], [0], [0], [1], [0, 0, 1, 1], [], []>} : vector<2x20xf32>, vector<20x20xf32>, vector<2x20xf32> -> vector<2x20xf32>
    %61 = arith.addf %59, %60 : vector<2x20xf32>
    %62 = arith.negf %61 : vector<2x20xf32>
    %63 = math.exp %62 : vector<2x20xf32>
    %cst_45 = arith.constant 1.000000e+00 : f32
    %64 = vector.broadcast %cst_45 : f32 to vector<2x20xf32>
    %65 = arith.addf %64, %63 : vector<2x20xf32>
    %66 = arith.divf %64, %65 : vector<2x20xf32>
    %67 = arith.mulf %54, %38 : vector<2x20xf32>
    %68 = arith.mulf %46, %58 : vector<2x20xf32>
    %69 = arith.addf %67, %68 : vector<2x20xf32>
    %70 = math.tanh %69 : vector<2x20xf32>
    %71 = arith.mulf %66, %70 : vector<2x20xf32>
    %c0_46 = arith.constant 0 : index
    %c0_47 = arith.constant 0 : index
    %c0_48 = arith.constant 0 : index
    %72 = vector.load %arg4[%c0_46, %c0_47, %c0_48] : memref<8x2x20xf32, #tpu.memory_space<vmem>>, vector<1x2x20xf32>
    %73 = vector.shape_cast %72 : vector<1x2x20xf32> to vector<2x20xf32>
    %74 = vector.shape_cast %71 : vector<2x20xf32> to vector<1x2x20xf32>
    tpu.vector_store %arg4[%c0_46, %c0_47, %c0_48], %74 {strides = array<i32>} : memref<8x2x20xf32, #tpu.memory_space<vmem>>, vector<1x2x20xf32>,
    %75 = vector.extract_strided_slice %7 {offsets = [2, 0], sizes = [2, 20], strides = [1, 1]} : vector<16x20xf32> to vector<2x20xf32>
    %cst_49 = arith.constant dense<0.000000e+00> : vector<2x20xf32>
    %76 = tpu.matmul %71, %30, %cst_49 {dimension_numbers = #tpu.dot_dimension_numbers<[1], [0], [0], [1], [0, 0, 1, 1], [], []>} : vector<2x20xf32>, vector<20x20xf32>, vector<2x20xf32> -> vector<2x20xf32>
    %77 = arith.addf %75, %76 : vector<2x20xf32>
    %78 = arith.negf %77 : vector<2x20xf32>
    %79 = math.exp %78 : vector<2x20xf32>
    %cst_50 = arith.constant 1.000000e+00 : f32
    %80 = vector.broadcast %cst_50 : f32 to vector<2x20xf32>
    %81 = arith.addf %80, %79 : vector<2x20xf32>
    %82 = arith.divf %80, %81 : vector<2x20xf32>
    %83 = vector.extract_strided_slice %14 {offsets = [2, 0], sizes = [2, 20], strides = [1, 1]} : vector<16x20xf32> to vector<2x20xf32>
    %cst_51 = arith.constant dense<0.000000e+00> : vector<2x20xf32>
    %84 = tpu.matmul %71, %32, %cst_51 {dimension_numbers = #tpu.dot_dimension_numbers<[1], [0], [0], [1], [0, 0, 1, 1], [], []>} : vector<2x20xf32>, vector<20x20xf32>, vector<2x20xf32> -> vector<2x20xf32>
    %85 = arith.addf %83, %84 : vector<2x20xf32>
    %86 = arith.negf %85 : vector<2x20xf32>
    %87 = math.exp %86 : vector<2x20xf32>
    %cst_52 = arith.constant 1.000000e+00 : f32
    %88 = vector.broadcast %cst_52 : f32 to vector<2x20xf32>
    %89 = arith.addf %88, %87 : vector<2x20xf32>
    %90 = arith.divf %88, %89 : vector<2x20xf32>
    %91 = vector.extract_strided_slice %21 {offsets = [2, 0], sizes = [2, 20], strides = [1, 1]} : vector<16x20xf32> to vector<2x20xf32>
    %cst_53 = arith.constant dense<0.000000e+00> : vector<2x20xf32>
    %92 = tpu.matmul %71, %34, %cst_53 {dimension_numbers = #tpu.dot_dimension_numbers<[1], [0], [0], [1], [0, 0, 1, 1], [], []>} : vector<2x20xf32>, vector<20x20xf32>, vector<2x20xf32> -> vector<2x20xf32>
    %93 = arith.addf %91, %92 : vector<2x20xf32>
    %94 = math.tanh %93 : vector<2x20xf32>
    %95 = vector.extract_strided_slice %28 {offsets = [2, 0], sizes = [2, 20], strides = [1, 1]} : vector<16x20xf32> to vector<2x20xf32>
    %cst_54 = arith.constant dense<0.000000e+00> : vector<2x20xf32>
    %96 = tpu.matmul %71, %36, %cst_54 {dimension_numbers = #tpu.dot_dimension_numbers<[1], [0], [0], [1], [0, 0, 1, 1], [], []>} : vector<2x20xf32>, vector<20x20xf32>, vector<2x20xf32> -> vector<2x20xf32>
    %97 = arith.addf %95, %96 : vector<2x20xf32>
    %98 = arith.negf %97 : vector<2x20xf32>
    %99 = math.exp %98 : vector<2x20xf32>
    %cst_55 = arith.constant 1.000000e+00 : f32
    %100 = vector.broadcast %cst_55 : f32 to vector<2x20xf32>
    %101 = arith.addf %100, %99 : vector<2x20xf32>
    %102 = arith.divf %100, %101 : vector<2x20xf32>
    %103 = arith.mulf %90, %69 : vector<2x20xf32>
    %104 = arith.mulf %82, %94 : vector<2x20xf32>
    %105 = arith.addf %103, %104 : vector<2x20xf32>
    %106 = math.tanh %105 : vector<2x20xf32>
    %107 = arith.mulf %102, %106 : vector<2x20xf32>
    %c1_56 = arith.constant 1 : index
    %c0_57 = arith.constant 0 : index
    %c0_58 = arith.constant 0 : index
    %108 = vector.load %arg4[%c1_56, %c0_57, %c0_58] : memref<8x2x20xf32, #tpu.memory_space<vmem>>, vector<1x2x20xf32>
    %109 = vector.shape_cast %108 : vector<1x2x20xf32> to vector<2x20xf32>
    %110 = vector.shape_cast %107 : vector<2x20xf32> to vector<1x2x20xf32>
    tpu.vector_store %arg4[%c1_56, %c0_57, %c0_58], %110 {strides = array<i32>} : memref<8x2x20xf32, #tpu.memory_space<vmem>>, vector<1x2x20xf32>,
    %111 = vector.extract_strided_slice %7 {offsets = [4, 0], sizes = [2, 20], strides = [1, 1]} : vector<16x20xf32> to vector<2x20xf32>
    %cst_59 = arith.constant dense<0.000000e+00> : vector<2x20xf32>
    %112 = tpu.matmul %107, %30, %cst_59 {dimension_numbers = #tpu.dot_dimension_numbers<[1], [0], [0], [1], [0, 0, 1, 1], [], []>} : vector<2x20xf32>, vector<20x20xf32>, vector<2x20xf32> -> vector<2x20xf32>
    %113 = arith.addf %111, %112 : vector<2x20xf32>
    %114 = arith.negf %113 : vector<2x20xf32>
    %115 = math.exp %114 : vector<2x20xf32>
    %cst_60 = arith.constant 1.000000e+00 : f32
    %116 = vector.broadcast %cst_60 : f32 to vector<2x20xf32>
    %117 = arith.addf %116, %115 : vector<2x20xf32>
    %118 = arith.divf %116, %117 : vector<2x20xf32>
    %119 = vector.extract_strided_slice %14 {offsets = [4, 0], sizes = [2, 20], strides = [1, 1]} : vector<16x20xf32> to vector<2x20xf32>
    %cst_61 = arith.constant dense<0.000000e+00> : vector<2x20xf32>
    %120 = tpu.matmul %107, %32, %cst_61 {dimension_numbers = #tpu.dot_dimension_numbers<[1], [0], [0], [1], [0, 0, 1, 1], [], []>} : vector<2x20xf32>, vector<20x20xf32>, vector<2x20xf32> -> vector<2x20xf32>
    %121 = arith.addf %119, %120 : vector<2x20xf32>
    %122 = arith.negf %121 : vector<2x20xf32>
    %123 = math.exp %122 : vector<2x20xf32>
    %cst_62 = arith.constant 1.000000e+00 : f32
    %124 = vector.broadcast %cst_62 : f32 to vector<2x20xf32>
    %125 = arith.addf %124, %123 : vector<2x20xf32>
    %126 = arith.divf %124, %125 : vector<2x20xf32>
    %127 = vector.extract_strided_slice %21 {offsets = [4, 0], sizes = [2, 20], strides = [1, 1]} : vector<16x20xf32> to vector<2x20xf32>
    %cst_63 = arith.constant dense<0.000000e+00> : vector<2x20xf32>
    %128 = tpu.matmul %107, %34, %cst_63 {dimension_numbers = #tpu.dot_dimension_numbers<[1], [0], [0], [1], [0, 0, 1, 1], [], []>} : vector<2x20xf32>, vector<20x20xf32>, vector<2x20xf32> -> vector<2x20xf32>
    %129 = arith.addf %127, %128 : vector<2x20xf32>
    %130 = math.tanh %129 : vector<2x20xf32>
    %131 = vector.extract_strided_slice %28 {offsets = [4, 0], sizes = [2, 20], strides = [1, 1]} : vector<16x20xf32> to vector<2x20xf32>
    %cst_64 = arith.constant dense<0.000000e+00> : vector<2x20xf32>
    %132 = tpu.matmul %107, %36, %cst_64 {dimension_numbers = #tpu.dot_dimension_numbers<[1], [0], [0], [1], [0, 0, 1, 1], [], []>} : vector<2x20xf32>, vector<20x20xf32>, vector<2x20xf32> -> vector<2x20xf32>
    %133 = arith.addf %131, %132 : vector<2x20xf32>
    %134 = arith.negf %133 : vector<2x20xf32>
    %135 = math.exp %134 : vector<2x20xf32>
    %cst_65 = arith.constant 1.000000e+00 : f32
    %136 = vector.broadcast %cst_65 : f32 to vector<2x20xf32>
    %137 = arith.addf %136, %135 : vector<2x20xf32>
    %138 = arith.divf %136, %137 : vector<2x20xf32>
    %139 = arith.mulf %126, %105 : vector<2x20xf32>
    %140 = arith.mulf %118, %130 : vector<2x20xf32>
    %141 = arith.addf %139, %140 : vector<2x20xf32>
    %142 = math.tanh %141 : vector<2x20xf32>
    %143 = arith.mulf %138, %142 : vector<2x20xf32>
    %c2_66 = arith.constant 2 : index
    %c0_67 = arith.constant 0 : index
    %c0_68 = arith.constant 0 : index
    %144 = vector.load %arg4[%c2_66, %c0_67, %c0_68] : memref<8x2x20xf32, #tpu.memory_space<vmem>>, vector<1x2x20xf32>
    %145 = vector.shape_cast %144 : vector<1x2x20xf32> to vector<2x20xf32>
    %146 = vector.shape_cast %143 : vector<2x20xf32> to vector<1x2x20xf32>
    tpu.vector_store %arg4[%c2_66, %c0_67, %c0_68], %146 {strides = array<i32>} : memref<8x2x20xf32, #tpu.memory_space<vmem>>, vector<1x2x20xf32>,
    %147 = vector.extract_strided_slice %7 {offsets = [6, 0], sizes = [2, 20], strides = [1, 1]} : vector<16x20xf32> to vector<2x20xf32>
    %cst_69 = arith.constant dense<0.000000e+00> : vector<2x20xf32>
    %148 = tpu.matmul %143, %30, %cst_69 {dimension_numbers = #tpu.dot_dimension_numbers<[1], [0], [0], [1], [0, 0, 1, 1], [], []>} : vector<2x20xf32>, vector<20x20xf32>, vector<2x20xf32> -> vector<2x20xf32>
    %149 = arith.addf %147, %148 : vector<2x20xf32>
    %150 = arith.negf %149 : vector<2x20xf32>
    %151 = math.exp %150 : vector<2x20xf32>
    %cst_70 = arith.constant 1.000000e+00 : f32
    %152 = vector.broadcast %cst_70 : f32 to vector<2x20xf32>
    %153 = arith.addf %152, %151 : vector<2x20xf32>
    %154 = arith.divf %152, %153 : vector<2x20xf32>
    %155 = vector.extract_strided_slice %14 {offsets = [6, 0], sizes = [2, 20], strides = [1, 1]} : vector<16x20xf32> to vector<2x20xf32>
    %cst_71 = arith.constant dense<0.000000e+00> : vector<2x20xf32>
    %156 = tpu.matmul %143, %32, %cst_71 {dimension_numbers = #tpu.dot_dimension_numbers<[1], [0], [0], [1], [0, 0, 1, 1], [], []>} : vector<2x20xf32>, vector<20x20xf32>, vector<2x20xf32> -> vector<2x20xf32>
    %157 = arith.addf %155, %156 : vector<2x20xf32>
    %158 = arith.negf %157 : vector<2x20xf32>
    %159 = math.exp %158 : vector<2x20xf32>
    %cst_72 = arith.constant 1.000000e+00 : f32
    %160 = vector.broadcast %cst_72 : f32 to vector<2x20xf32>
    %161 = arith.addf %160, %159 : vector<2x20xf32>
    %162 = arith.divf %160, %161 : vector<2x20xf32>
    %163 = vector.extract_strided_slice %21 {offsets = [6, 0], sizes = [2, 20], strides = [1, 1]} : vector<16x20xf32> to vector<2x20xf32>
    %cst_73 = arith.constant dense<0.000000e+00> : vector<2x20xf32>
    %164 = tpu.matmul %143, %34, %cst_73 {dimension_numbers = #tpu.dot_dimension_numbers<[1], [0], [0], [1], [0, 0, 1, 1], [], []>} : vector<2x20xf32>, vector<20x20xf32>, vector<2x20xf32> -> vector<2x20xf32>
    %165 = arith.addf %163, %164 : vector<2x20xf32>
    %166 = math.tanh %165 : vector<2x20xf32>
    %167 = vector.extract_strided_slice %28 {offsets = [6, 0], sizes = [2, 20], strides = [1, 1]} : vector<16x20xf32> to vector<2x20xf32>
    %cst_74 = arith.constant dense<0.000000e+00> : vector<2x20xf32>
    %168 = tpu.matmul %143, %36, %cst_74 {dimension_numbers = #tpu.dot_dimension_numbers<[1], [0], [0], [1], [0, 0, 1, 1], [], []>} : vector<2x20xf32>, vector<20x20xf32>, vector<2x20xf32> -> vector<2x20xf32>
    %169 = arith.addf %167, %168 : vector<2x20xf32>
    %170 = arith.negf %169 : vector<2x20xf32>
    %171 = math.exp %170 : vector<2x20xf32>
    %cst_75 = arith.constant 1.000000e+00 : f32
    %172 = vector.broadcast %cst_75 : f32 to vector<2x20xf32>
    %173 = arith.addf %172, %171 : vector<2x20xf32>
    %174 = arith.divf %172, %173 : vector<2x20xf32>
    %175 = arith.mulf %162, %141 : vector<2x20xf32>
    %176 = arith.mulf %154, %166 : vector<2x20xf32>
    %177 = arith.addf %175, %176 : vector<2x20xf32>
    %178 = math.tanh %177 : vector<2x20xf32>
    %179 = arith.mulf %174, %178 : vector<2x20xf32>
    %c3_76 = arith.constant 3 : index
    %c0_77 = arith.constant 0 : index
    %c0_78 = arith.constant 0 : index
    %180 = vector.load %arg4[%c3_76, %c0_77, %c0_78] : memref<8x2x20xf32, #tpu.memory_space<vmem>>, vector<1x2x20xf32>
    %181 = vector.shape_cast %180 : vector<1x2x20xf32> to vector<2x20xf32>
    %182 = vector.shape_cast %179 : vector<2x20xf32> to vector<1x2x20xf32>
    tpu.vector_store %arg4[%c3_76, %c0_77, %c0_78], %182 {strides = array<i32>} : memref<8x2x20xf32, #tpu.memory_space<vmem>>, vector<1x2x20xf32>,
    %183 = vector.extract_strided_slice %7 {offsets = [8, 0], sizes = [2, 20], strides = [1, 1]} : vector<16x20xf32> to vector<2x20xf32>
    %cst_79 = arith.constant dense<0.000000e+00> : vector<2x20xf32>
    %184 = tpu.matmul %179, %30, %cst_79 {dimension_numbers = #tpu.dot_dimension_numbers<[1], [0], [0], [1], [0, 0, 1, 1], [], []>} : vector<2x20xf32>, vector<20x20xf32>, vector<2x20xf32> -> vector<2x20xf32>
    %185 = arith.addf %183, %184 : vector<2x20xf32>
    %186 = arith.negf %185 : vector<2x20xf32>
    %187 = math.exp %186 : vector<2x20xf32>
    %cst_80 = arith.constant 1.000000e+00 : f32
    %188 = vector.broadcast %cst_80 : f32 to vector<2x20xf32>
    %189 = arith.addf %188, %187 : vector<2x20xf32>
    %190 = arith.divf %188, %189 : vector<2x20xf32>
    %191 = vector.extract_strided_slice %14 {offsets = [8, 0], sizes = [2, 20], strides = [1, 1]} : vector<16x20xf32> to vector<2x20xf32>
    %cst_81 = arith.constant dense<0.000000e+00> : vector<2x20xf32>
    %192 = tpu.matmul %179, %32, %cst_81 {dimension_numbers = #tpu.dot_dimension_numbers<[1], [0], [0], [1], [0, 0, 1, 1], [], []>} : vector<2x20xf32>, vector<20x20xf32>, vector<2x20xf32> -> vector<2x20xf32>
    %193 = arith.addf %191, %192 : vector<2x20xf32>
    %194 = arith.negf %193 : vector<2x20xf32>
    %195 = math.exp %194 : vector<2x20xf32>
    %cst_82 = arith.constant 1.000000e+00 : f32
    %196 = vector.broadcast %cst_82 : f32 to vector<2x20xf32>
    %197 = arith.addf %196, %195 : vector<2x20xf32>
    %198 = arith.divf %196, %197 : vector<2x20xf32>
    %199 = vector.extract_strided_slice %21 {offsets = [8, 0], sizes = [2, 20], strides = [1, 1]} : vector<16x20xf32> to vector<2x20xf32>
    %cst_83 = arith.constant dense<0.000000e+00> : vector<2x20xf32>
    %200 = tpu.matmul %179, %34, %cst_83 {dimension_numbers = #tpu.dot_dimension_numbers<[1], [0], [0], [1], [0, 0, 1, 1], [], []>} : vector<2x20xf32>, vector<20x20xf32>, vector<2x20xf32> -> vector<2x20xf32>
    %201 = arith.addf %199, %200 : vector<2x20xf32>
    %202 = math.tanh %201 : vector<2x20xf32>
    %203 = vector.extract_strided_slice %28 {offsets = [8, 0], sizes = [2, 20], strides = [1, 1]} : vector<16x20xf32> to vector<2x20xf32>
    %cst_84 = arith.constant dense<0.000000e+00> : vector<2x20xf32>
    %204 = tpu.matmul %179, %36, %cst_84 {dimension_numbers = #tpu.dot_dimension_numbers<[1], [0], [0], [1], [0, 0, 1, 1], [], []>} : vector<2x20xf32>, vector<20x20xf32>, vector<2x20xf32> -> vector<2x20xf32>
    %205 = arith.addf %203, %204 : vector<2x20xf32>
    %206 = arith.negf %205 : vector<2x20xf32>
    %207 = math.exp %206 : vector<2x20xf32>
    %cst_85 = arith.constant 1.000000e+00 : f32
    %208 = vector.broadcast %cst_85 : f32 to vector<2x20xf32>
    %209 = arith.addf %208, %207 : vector<2x20xf32>
    %210 = arith.divf %208, %209 : vector<2x20xf32>
    %211 = arith.mulf %198, %177 : vector<2x20xf32>
    %212 = arith.mulf %190, %202 : vector<2x20xf32>
    %213 = arith.addf %211, %212 : vector<2x20xf32>
    %214 = math.tanh %213 : vector<2x20xf32>
    %215 = arith.mulf %210, %214 : vector<2x20xf32>
    %c4 = arith.constant 4 : index
    %c0_86 = arith.constant 0 : index
    %c0_87 = arith.constant 0 : index
    %216 = vector.load %arg4[%c4, %c0_86, %c0_87] : memref<8x2x20xf32, #tpu.memory_space<vmem>>, vector<1x2x20xf32>
    %217 = vector.shape_cast %216 : vector<1x2x20xf32> to vector<2x20xf32>
    %218 = vector.shape_cast %215 : vector<2x20xf32> to vector<1x2x20xf32>
    tpu.vector_store %arg4[%c4, %c0_86, %c0_87], %218 {strides = array<i32>} : memref<8x2x20xf32, #tpu.memory_space<vmem>>, vector<1x2x20xf32>,
    %219 = vector.extract_strided_slice %7 {offsets = [10, 0], sizes = [2, 20], strides = [1, 1]} : vector<16x20xf32> to vector<2x20xf32>
    %cst_88 = arith.constant dense<0.000000e+00> : vector<2x20xf32>
    %220 = tpu.matmul %215, %30, %cst_88 {dimension_numbers = #tpu.dot_dimension_numbers<[1], [0], [0], [1], [0, 0, 1, 1], [], []>} : vector<2x20xf32>, vector<20x20xf32>, vector<2x20xf32> -> vector<2x20xf32>
    %221 = arith.addf %219, %220 : vector<2x20xf32>
    %222 = arith.negf %221 : vector<2x20xf32>
    %223 = math.exp %222 : vector<2x20xf32>
    %cst_89 = arith.constant 1.000000e+00 : f32
    %224 = vector.broadcast %cst_89 : f32 to vector<2x20xf32>
    %225 = arith.addf %224, %223 : vector<2x20xf32>
    %226 = arith.divf %224, %225 : vector<2x20xf32>
    %227 = vector.extract_strided_slice %14 {offsets = [10, 0], sizes = [2, 20], strides = [1, 1]} : vector<16x20xf32> to vector<2x20xf32>
    %cst_90 = arith.constant dense<0.000000e+00> : vector<2x20xf32>
    %228 = tpu.matmul %215, %32, %cst_90 {dimension_numbers = #tpu.dot_dimension_numbers<[1], [0], [0], [1], [0, 0, 1, 1], [], []>} : vector<2x20xf32>, vector<20x20xf32>, vector<2x20xf32> -> vector<2x20xf32>
    %229 = arith.addf %227, %228 : vector<2x20xf32>
    %230 = arith.negf %229 : vector<2x20xf32>
    %231 = math.exp %230 : vector<2x20xf32>
    %cst_91 = arith.constant 1.000000e+00 : f32
    %232 = vector.broadcast %cst_91 : f32 to vector<2x20xf32>
    %233 = arith.addf %232, %231 : vector<2x20xf32>
    %234 = arith.divf %232, %233 : vector<2x20xf32>
    %235 = vector.extract_strided_slice %21 {offsets = [10, 0], sizes = [2, 20], strides = [1, 1]} : vector<16x20xf32> to vector<2x20xf32>
    %cst_92 = arith.constant dense<0.000000e+00> : vector<2x20xf32>
    %236 = tpu.matmul %215, %34, %cst_92 {dimension_numbers = #tpu.dot_dimension_numbers<[1], [0], [0], [1], [0, 0, 1, 1], [], []>} : vector<2x20xf32>, vector<20x20xf32>, vector<2x20xf32> -> vector<2x20xf32>
    %237 = arith.addf %235, %236 : vector<2x20xf32>
    %238 = math.tanh %237 : vector<2x20xf32>
    %239 = vector.extract_strided_slice %28 {offsets = [10, 0], sizes = [2, 20], strides = [1, 1]} : vector<16x20xf32> to vector<2x20xf32>
    %cst_93 = arith.constant dense<0.000000e+00> : vector<2x20xf32>
    %240 = tpu.matmul %215, %36, %cst_93 {dimension_numbers = #tpu.dot_dimension_numbers<[1], [0], [0], [1], [0, 0, 1, 1], [], []>} : vector<2x20xf32>, vector<20x20xf32>, vector<2x20xf32> -> vector<2x20xf32>
    %241 = arith.addf %239, %240 : vector<2x20xf32>
    %242 = arith.negf %241 : vector<2x20xf32>
    %243 = math.exp %242 : vector<2x20xf32>
    %cst_94 = arith.constant 1.000000e+00 : f32
    %244 = vector.broadcast %cst_94 : f32 to vector<2x20xf32>
    %245 = arith.addf %244, %243 : vector<2x20xf32>
    %246 = arith.divf %244, %245 : vector<2x20xf32>
    %247 = arith.mulf %234, %213 : vector<2x20xf32>
    %248 = arith.mulf %226, %238 : vector<2x20xf32>
    %249 = arith.addf %247, %248 : vector<2x20xf32>
    %250 = math.tanh %249 : vector<2x20xf32>
    %251 = arith.mulf %246, %250 : vector<2x20xf32>
    %c5 = arith.constant 5 : index
    %c0_95 = arith.constant 0 : index
    %c0_96 = arith.constant 0 : index
    %252 = vector.load %arg4[%c5, %c0_95, %c0_96] : memref<8x2x20xf32, #tpu.memory_space<vmem>>, vector<1x2x20xf32>
    %253 = vector.shape_cast %252 : vector<1x2x20xf32> to vector<2x20xf32>
    %254 = vector.shape_cast %251 : vector<2x20xf32> to vector<1x2x20xf32>
    tpu.vector_store %arg4[%c5, %c0_95, %c0_96], %254 {strides = array<i32>} : memref<8x2x20xf32, #tpu.memory_space<vmem>>, vector<1x2x20xf32>,
    %255 = vector.extract_strided_slice %7 {offsets = [12, 0], sizes = [2, 20], strides = [1, 1]} : vector<16x20xf32> to vector<2x20xf32>
    %cst_97 = arith.constant dense<0.000000e+00> : vector<2x20xf32>
    %256 = tpu.matmul %251, %30, %cst_97 {dimension_numbers = #tpu.dot_dimension_numbers<[1], [0], [0], [1], [0, 0, 1, 1], [], []>} : vector<2x20xf32>, vector<20x20xf32>, vector<2x20xf32> -> vector<2x20xf32>
    %257 = arith.addf %255, %256 : vector<2x20xf32>
    %258 = arith.negf %257 : vector<2x20xf32>
    %259 = math.exp %258 : vector<2x20xf32>
    %cst_98 = arith.constant 1.000000e+00 : f32
    %260 = vector.broadcast %cst_98 : f32 to vector<2x20xf32>
    %261 = arith.addf %260, %259 : vector<2x20xf32>
    %262 = arith.divf %260, %261 : vector<2x20xf32>
    %263 = vector.extract_strided_slice %14 {offsets = [12, 0], sizes = [2, 20], strides = [1, 1]} : vector<16x20xf32> to vector<2x20xf32>
    %cst_99 = arith.constant dense<0.000000e+00> : vector<2x20xf32>
    %264 = tpu.matmul %251, %32, %cst_99 {dimension_numbers = #tpu.dot_dimension_numbers<[1], [0], [0], [1], [0, 0, 1, 1], [], []>} : vector<2x20xf32>, vector<20x20xf32>, vector<2x20xf32> -> vector<2x20xf32>
    %265 = arith.addf %263, %264 : vector<2x20xf32>
    %266 = arith.negf %265 : vector<2x20xf32>
    %267 = math.exp %266 : vector<2x20xf32>
    %cst_100 = arith.constant 1.000000e+00 : f32
    %268 = vector.broadcast %cst_100 : f32 to vector<2x20xf32>
    %269 = arith.addf %268, %267 : vector<2x20xf32>
    %270 = arith.divf %268, %269 : vector<2x20xf32>
    %271 = vector.extract_strided_slice %21 {offsets = [12, 0], sizes = [2, 20], strides = [1, 1]} : vector<16x20xf32> to vector<2x20xf32>
    %cst_101 = arith.constant dense<0.000000e+00> : vector<2x20xf32>
    %272 = tpu.matmul %251, %34, %cst_101 {dimension_numbers = #tpu.dot_dimension_numbers<[1], [0], [0], [1], [0, 0, 1, 1], [], []>} : vector<2x20xf32>, vector<20x20xf32>, vector<2x20xf32> -> vector<2x20xf32>
    %273 = arith.addf %271, %272 : vector<2x20xf32>
    %274 = math.tanh %273 : vector<2x20xf32>
    %275 = vector.extract_strided_slice %28 {offsets = [12, 0], sizes = [2, 20], strides = [1, 1]} : vector<16x20xf32> to vector<2x20xf32>
    %cst_102 = arith.constant dense<0.000000e+00> : vector<2x20xf32>
    %276 = tpu.matmul %251, %36, %cst_102 {dimension_numbers = #tpu.dot_dimension_numbers<[1], [0], [0], [1], [0, 0, 1, 1], [], []>} : vector<2x20xf32>, vector<20x20xf32>, vector<2x20xf32> -> vector<2x20xf32>
    %277 = arith.addf %275, %276 : vector<2x20xf32>
    %278 = arith.negf %277 : vector<2x20xf32>
    %279 = math.exp %278 : vector<2x20xf32>
    %cst_103 = arith.constant 1.000000e+00 : f32
    %280 = vector.broadcast %cst_103 : f32 to vector<2x20xf32>
    %281 = arith.addf %280, %279 : vector<2x20xf32>
    %282 = arith.divf %280, %281 : vector<2x20xf32>
    %283 = arith.mulf %270, %249 : vector<2x20xf32>
    %284 = arith.mulf %262, %274 : vector<2x20xf32>
    %285 = arith.addf %283, %284 : vector<2x20xf32>
    %286 = math.tanh %285 : vector<2x20xf32>
    %287 = arith.mulf %282, %286 : vector<2x20xf32>
    %c6 = arith.constant 6 : index
    %c0_104 = arith.constant 0 : index
    %c0_105 = arith.constant 0 : index
    %288 = vector.load %arg4[%c6, %c0_104, %c0_105] : memref<8x2x20xf32, #tpu.memory_space<vmem>>, vector<1x2x20xf32>
    %289 = vector.shape_cast %288 : vector<1x2x20xf32> to vector<2x20xf32>
    %290 = vector.shape_cast %287 : vector<2x20xf32> to vector<1x2x20xf32>
    tpu.vector_store %arg4[%c6, %c0_104, %c0_105], %290 {strides = array<i32>} : memref<8x2x20xf32, #tpu.memory_space<vmem>>, vector<1x2x20xf32>,
    %291 = vector.extract_strided_slice %7 {offsets = [14, 0], sizes = [2, 20], strides = [1, 1]} : vector<16x20xf32> to vector<2x20xf32>
    %cst_106 = arith.constant dense<0.000000e+00> : vector<2x20xf32>
    %292 = tpu.matmul %287, %30, %cst_106 {dimension_numbers = #tpu.dot_dimension_numbers<[1], [0], [0], [1], [0, 0, 1, 1], [], []>} : vector<2x20xf32>, vector<20x20xf32>, vector<2x20xf32> -> vector<2x20xf32>
    %293 = arith.addf %291, %292 : vector<2x20xf32>
    %294 = arith.negf %293 : vector<2x20xf32>
    %295 = math.exp %294 : vector<2x20xf32>
    %cst_107 = arith.constant 1.000000e+00 : f32
    %296 = vector.broadcast %cst_107 : f32 to vector<2x20xf32>
    %297 = arith.addf %296, %295 : vector<2x20xf32>
    %298 = arith.divf %296, %297 : vector<2x20xf32>
    %299 = vector.extract_strided_slice %14 {offsets = [14, 0], sizes = [2, 20], strides = [1, 1]} : vector<16x20xf32> to vector<2x20xf32>
    %cst_108 = arith.constant dense<0.000000e+00> : vector<2x20xf32>
    %300 = tpu.matmul %287, %32, %cst_108 {dimension_numbers = #tpu.dot_dimension_numbers<[1], [0], [0], [1], [0, 0, 1, 1], [], []>} : vector<2x20xf32>, vector<20x20xf32>, vector<2x20xf32> -> vector<2x20xf32>
    %301 = arith.addf %299, %300 : vector<2x20xf32>
    %302 = arith.negf %301 : vector<2x20xf32>
    %303 = math.exp %302 : vector<2x20xf32>
    %cst_109 = arith.constant 1.000000e+00 : f32
    %304 = vector.broadcast %cst_109 : f32 to vector<2x20xf32>
    %305 = arith.addf %304, %303 : vector<2x20xf32>
    %306 = arith.divf %304, %305 : vector<2x20xf32>
    %307 = vector.extract_strided_slice %21 {offsets = [14, 0], sizes = [2, 20], strides = [1, 1]} : vector<16x20xf32> to vector<2x20xf32>
    %cst_110 = arith.constant dense<0.000000e+00> : vector<2x20xf32>
    %308 = tpu.matmul %287, %34, %cst_110 {dimension_numbers = #tpu.dot_dimension_numbers<[1], [0], [0], [1], [0, 0, 1, 1], [], []>} : vector<2x20xf32>, vector<20x20xf32>, vector<2x20xf32> -> vector<2x20xf32>
    %309 = arith.addf %307, %308 : vector<2x20xf32>
    %310 = math.tanh %309 : vector<2x20xf32>
    %311 = vector.extract_strided_slice %28 {offsets = [14, 0], sizes = [2, 20], strides = [1, 1]} : vector<16x20xf32> to vector<2x20xf32>
    %cst_111 = arith.constant dense<0.000000e+00> : vector<2x20xf32>
    %312 = tpu.matmul %287, %36, %cst_111 {dimension_numbers = #tpu.dot_dimension_numbers<[1], [0], [0], [1], [0, 0, 1, 1], [], []>} : vector<2x20xf32>, vector<20x20xf32>, vector<2x20xf32> -> vector<2x20xf32>
    %313 = arith.addf %311, %312 : vector<2x20xf32>
    %314 = arith.negf %313 : vector<2x20xf32>
    %315 = math.exp %314 : vector<2x20xf32>
    %cst_112 = arith.constant 1.000000e+00 : f32
    %316 = vector.broadcast %cst_112 : f32 to vector<2x20xf32>
    %317 = arith.addf %316, %315 : vector<2x20xf32>
    %318 = arith.divf %316, %317 : vector<2x20xf32>
    %319 = arith.mulf %306, %285 : vector<2x20xf32>
    %320 = arith.mulf %298, %310 : vector<2x20xf32>
    %321 = arith.addf %319, %320 : vector<2x20xf32>
    %322 = math.tanh %321 : vector<2x20xf32>
    %323 = arith.mulf %318, %322 : vector<2x20xf32>
    %c7 = arith.constant 7 : index
    %c0_113 = arith.constant 0 : index
    %c0_114 = arith.constant 0 : index
    %324 = vector.load %arg4[%c7, %c0_113, %c0_114] : memref<8x2x20xf32, #tpu.memory_space<vmem>>, vector<1x2x20xf32>
    %325 = vector.shape_cast %324 : vector<1x2x20xf32> to vector<2x20xf32>
    %326 = vector.shape_cast %323 : vector<2x20xf32> to vector<1x2x20xf32>
    tpu.vector_store %arg4[%c7, %c0_113, %c0_114], %326 {strides = array<i32>} : memref<8x2x20xf32, #tpu.memory_space<vmem>>, vector<1x2x20xf32>,
    %c0_115 = arith.constant 0 : index
    %c0_116 = arith.constant 0 : index
    %327 = vector.load %arg5[%c0_115, %c0_116] : memref<2x20xf32, #tpu.memory_space<vmem>>, vector<2x20xf32>
    tpu.vector_store %arg5[%c0_115, %c0_116], %321 {strides = array<i32>} : memref<2x20xf32, #tpu.memory_space<vmem>>, vector<2x20xf32>,
    return
  }
}

</mosaic_0001>

<bundles_post_ra>
// kernel: tpu_custom_call.1
= control target key start
LH: loop header
LB: loop body
LE: loop exit
PB: predicated region body
PF: predicated region fallthrough
CT: control target
= control target key end

     0   :  { %11 = vsyncpa [#allocation3], 0  ;;  %vm35_vm0 = vcmask 1043456   ;;  %vm28_vm1 = vcmask 31744   ;;  %s2261_s0 = inlined_call_operand.vmem [shape: f32[16,4], index: 0, kind: input, shape index: {}]   ;;  %s2262_s1 = inlined_call_operand.vmem [shape: f32[4,4,20], index: 1, kind: input, shape index: {}]   ;;  %s2263_s2 = inlined_call_operand.vmem [shape: f32[4,20,20], index: 2, kind: input, shape index: {}]   ;;  %s2264_s3 = inlined_call_operand.vmem [shape: f32[4,1,20], index: 3, kind: input, shape index: {}]   ;;  %s2265_s4 = inlined_call_operand.hbm [shape: f32[8,2,20], index: 4, kind: output, shape index: {0}]   ;;  %s2266_s5 = inlined_call_operand.hbm [shape: f32[2,20], index: 5, kind: output, shape index: {1}]  }
   0x1   :  { %v23_v0 = vld [vmem:[%s2262_s1] sm:$0xf]  ;;  %v1544_v1 = vld [vmem:[%s2262_s1 + $0x4] sm:$0xf]  ;;  %v1554_v3 = vld [vmem:[%s2262_s1 + $0xc] sm:$0xf] }
   0x2   :  { %v21_v2 = vld [vmem:[%s2261_s0] sm:$0xff]  ;;  %1541 = vmatpush.msk.msra.mxu0 %vm35_vm0, %v23_v0  ;;  %1546 = vmatpush.msk.msra.mxu1 %vm35_vm0, %v1544_v1  ;;  %v1549_v4 = vld [vmem:[%s2262_s1 + $0x8] sm:$0xf]  ;;  %v1910_v5 = vld [vmem:[%s2263_s2 + $0x10] sm:$0xf] }
   0x3   :  { %1556 = vmatpush.msk.msra.mxu3 %vm35_vm0, %v1554_v3  ;;  %1542 = vmatmul.msk.f32.vlgmr.msra.gmra.mxu0 %vm28_vm1, %v21_v2  ;;  %v1915_v6 = vld [vmem:[%s2263_s2 + $0x28] sm:$0xf]  ;;  %v1922_v7 = vld [vmem:[%s2263_s2 + $0x58] sm:$0xf]  ;;  %v1935_v9 = vld [vmem:[%s2263_s2 + $0x20] sm:$0xff] }
   0x4   :  { %1547 = vmatmul.msk.f32.vlgmr.msra.gmra.mxu1 %vm28_vm1, %v21_v2  ;;  %1551 = vmatpush.msk.msra.mxu2 %vm35_vm0, %v1549_v4  ;;  %v1927_v8 = vld [vmem:[%s2263_s2 + $0x8] sm:$0xff]  ;;  %v1940_v10 = vld [vmem:[%s2263_s2] sm:$0xff]  ;;  %v1956_v13 = vld [vmem:[%s2263_s2 + $0x18] sm:$0xff] }
   0x5   :  { %1557 = vmatmul.msk.f32.vlgmr.msra.gmra.mxu3 %vm28_vm1, %v21_v2  ;;  %1568 = vmatpush.msk.msrb.mxu0 %vm35_vm0, %v1910_v5  ;;  %v1945_v11 = vld [vmem:[%s2263_s2 + $0x40] sm:$0xf]  ;;  %v22_v12 = vld [vmem:[%s2261_s0 + $0x8] sm:$0xff]  ;;  %v1961_v14 = vld [vmem:[%s2263_s2 + $0x50] sm:$0xff] }
   0x6   :  { %1570 = vmatpush.msk.msrb.mxu1 %vm35_vm0, %v1915_v6  ;;  %1552 = vmatmul.msk.f32.vlgmr.msra.gmra.mxu2 %vm28_vm1, %v21_v2  ;;  %v1966_v15 = vld [vmem:[%s2263_s2 + $0x38] sm:$0xff]  ;;  %v1974_v16 = vld [vmem:[%s2263_s2 + $0x48] sm:$0xff] }
   0x7   :  { %1573 = vmatpush.msk.msrb.mxu3 %vm35_vm0, %v1922_v7  ;;  %197 = vmatpush.msrb.mxu0 %v1927_v8 }
   0x8   :  { %240 = vmatpush.msrb.mxu1 %v1935_v9  ;;  %1572 = vmatpush.msk.msrb.mxu2 %vm35_vm0, %v1945_v11 }
   0x9   :  { %12 = vsyncpa [#allocation5], 0  ;;  %198 = vmatpush.msrb.mxu0 %v1940_v10  ;;  %308 = vmatpush.msrb.mxu3 %v1961_v14  ;;  %v1984_v17 = vld [vmem:[%s2263_s2 + $0x30] sm:$0xff]  ;;  %v1853_v18 = vmov 0.0   ;;  %v1657_v21 = vld [vmem:[%s2264_s3] ss:$0 sm:$0xff] }
   0xa   :  { %241 = vmatpush.msrb.mxu1 %v1956_v13  ;;  %283 = vmatpush.msrb.mxu2 %v1966_v15  ;;  %v1658_v22 = vld [vmem:[%s2264_s3 + $0x1] ss:$0 sm:$0xff]  ;;  %v1659_v30 = vld [vmem:[%s2264_s3 + $0x3] ss:$0 sm:$0xff]  ;;  %v1660_v32 = vld [vmem:[%s2264_s3 + $0x2] ss:$0 sm:$0xff] }
   0xb   :  { %1543 = vmatmul.msk.f32.gmra.mxu0 %vm28_vm1, %v22_v12  ;;  %309 = vmatpush.msrb.mxu3 %v1974_v16  ;;  %vm176_vm14 = vcmask 162816   ;;  %vm339_vm15 = vcmask 156672   ;;  %s1527_s8 = sshll.u32 %s2266_s5, 4  ;;  %s1855_s3 = smov [#allocation2]   ;;  %s1528_s8 = int_to_ptr.hbm [resolvable:$true] %s1527_s8 }
   0xc   :  { %1548 = vmatmul.msk.f32.gmra.mxu1 %vm28_vm1, %v22_v12  ;;  %284 = vmatpush.msrb.mxu2 %v1984_v17  ;;  %s1511_s9 = sshll.u32 %s1855_s3, 4  ;;  %s1513_s11 = sshll.u32 %s2265_s4, 4  ;;  %s1512_s9 = int_to_ptr.vmem [resolvable:$true] %s1511_s9  ;;  %s1514_s11 = int_to_ptr.hbm [resolvable:$true] %s1513_s11 }
   0xd   :  { %1558 = vmatmul.msk.f32.gmra.mxu3 %vm28_vm1, %v22_v12  ;;  %1575 = vmatpush.msk.msra.mxu0 %vm35_vm0, %v1910_v5  ;;  %s1856_s12 = smov 32   ;;  %s1857_s13 = smov 2  }
   0xe   :  { %1553 = vmatmul.msk.f32.gmra.mxu2 %vm28_vm1, %v22_v12  ;;  %1578 = vmatpush.msk.msra.mxu1 %vm35_vm0, %v1915_v6 }
   0xf   :  { %358 = vmatpush.msra.mxu0 %v1927_v8  ;;  %1581 = vmatpush.msk.msra.mxu2 %vm35_vm0, %v1945_v11 }
  0x10   :  { %401 = vmatpush.msra.mxu1 %v1935_v9  ;;  %1583 = vmatpush.msk.msra.mxu3 %vm35_vm0, %v1922_v7 }
  0x11   :  { %444 = vmatpush.msra.mxu2 %v1966_v15  ;;  %359 = vmatpush.msra.mxu0 %v1940_v10 }
  0x12   :  { %469 = vmatpush.msra.mxu3 %v1961_v14  ;;  %402 = vmatpush.msra.mxu1 %v1956_v13 }
  0x13   :  { %199 = vmatmul.f32.vlgmr.msrb.gmra.mxu0 %v1853_v18  ;;  %445 = vmatpush.msra.mxu2 %v1984_v17 }
  0x14   :  { %242 = vmatmul.f32.vlgmr.msrb.gmra.mxu1 %v1853_v18  ;;  %470 = vmatpush.msra.mxu3 %v1974_v16 }
  0x15   :  { %310 = vmatmul.f32.vlgmr.msrb.gmra.mxu3 %v1853_v18  ;;  %1586 = vmatpush.msk.msrb.mxu0 %vm35_vm0, %v1910_v5 }
  0x16   :  { %285 = vmatmul.f32.vlgmr.msrb.gmra.mxu2 %v1853_v18  ;;  %1589 = vmatpush.msk.msrb.mxu1 %vm35_vm0, %v1915_v6 }
  0x17   :  { %527 = vmatpush.msrb.mxu0 %v1927_v8  ;;  %1592 = vmatpush.msk.msrb.mxu2 %vm35_vm0, %v1945_v11 }
  0x18   :  { %570 = vmatpush.msrb.mxu1 %v1935_v9  ;;  %1594 = vmatpush.msk.msrb.mxu3 %vm35_vm0, %v1922_v7 }
  0x19   :  { %613 = vmatpush.msrb.mxu2 %v1966_v15  ;;  %528 = vmatpush.msrb.mxu0 %v1940_v10 }
  0x1a   :  { %638 = vmatpush.msrb.mxu3 %v1961_v14  ;;  %571 = vmatpush.msrb.mxu1 %v1956_v13 }
  0x1b   :  { %614 = vmatpush.msrb.mxu2 %v1984_v17 }
  0x1c   :  { %639 = vmatpush.msrb.mxu3 %v1974_v16 }
  0x80   :  { %v56_v19 = vpop.f32.mrf.mxu0 }
  0x81   :  { %v89_v20 = vpop.f32.mrf.mxu1  ;;  %v2036_v29 = vadd.f32 %v1657_v21, %v56_v19 }
  0x82   :  { %v2041_v31 = vadd.f32 %v1658_v22, %v89_v20 }
  0x88   :  { %v155_v23 = vpop.f32.mrf.mxu3  ;;  %v59_v24 = vpop.f32.mrf.mxu0 }
  0x89   :  { %v122_v25 = vpop.f32.mrf.mxu2  ;;  %v2032_v26 = vadd.f32 %v1657_v21, %v59_v24  ;;  %v92_v27 = vpop.f32.mrf.mxu1  ;;  %v2052_v43 = vadd.f32 %v1659_v30, %v155_v23 }
  0x8a   :  { %v2034_v28 = vadd.f32 %v1658_v22, %v92_v27  ;;  %v2055_v51 = vadd.f32 %v1660_v32, %v122_v25 }
  0x90   :  { %v158_v33 = vpop.f32.mrf.mxu3  ;;  %v200_v34 = vpop.f32.mrf.mxu0 }
  0x91   :  { %v2046_v35 = vadd.f32 %v1659_v30, %v158_v33  ;;  %v125_v36 = vpop.f32.mrf.mxu2  ;;  %v203_v37 = vadd.f32 %v200_v34, %v2036_v29  ;;  %v243_v38 = vpop.f32.mrf.mxu1 }
  0x92   :  { %v2049_v39 = vadd.f32 %v1660_v32, %v125_v36  ;;  %v246_v40 = vadd.f32 %v243_v38, %v2041_v31 }
  0x93   :  { %v1569_v41 = vmul.f32 -1.442695, %v203_v37 }
  0x94   :  { %v1571_v42 = vmul.f32 -1.442695, %v246_v40 }
  0x95   :  { %1661 = vpow2.f32 %v1569_v41 }
  0x96   :  { %1663 = vpow2.f32 %v1571_v42 }
  0x98   :  { %v311_v44 = vpop.f32.mrf.mxu3 }
  0x99   :  { %v314_v45 = vadd.f32 %v311_v44, %v2052_v43  ;;  %v286_v52 = vpop.f32.mrf.mxu2 }
  0x9a   :  { %v289_v56 = vadd.f32 %v286_v52, %v2055_v51 }
  0x9b   :  { %v1662_v46 = vpop.eup %1661  ;;  %v1574_v47 = vmul.f32 -1.442695, %v314_v45 }
  0x9c   :  { %v1664_v48 = vpop.eup %1663  ;;  %v207_v49 = vadd.f32 1.0, %v1662_v46 }
  0x9d   :  { %v250_v50 = vadd.f32 1.0, %v1664_v48  ;;  %1665 = vpow2.f32 %v1574_v47 }
  0x9e   :  { %1667 = vrcp.f32 %v207_v49  ;;  %v219_v62 = vand.u32 2147483648, %v207_v49  ;;  %v217_v1 = vand.u32 2147483647, %v207_v49  ;;  %vm213_vm4 = vweird.f32 %v207_v49 }
  0x9f   :  { %1669 = vrcp.f32 %v250_v50  ;;  %v262_v63 = vand.u32 2147483648, %v250_v50  ;;  %v260_v3 = vand.u32 2147483647, %v250_v50  ;;  %vm256_vm5 = vweird.f32 %v250_v50 }
  0xa0   :  { %v220_v18 = vor.u32 1.1754944e-38, %v219_v62  ;;  %vm218_vm7 = vcmp.eq.f32.partialorder %v217_v1, 8.507059e+37 }
  0xa1   :  { %v263_v20 = vor.u32 1.1754944e-38, %v262_v63  ;;  %vm261_vm9 = vcmp.eq.f32.partialorder %v260_v3, 8.507059e+37 }
  0xa3   :  { %v1666_v53 = vpop.eup %1665 }
  0xa4   :  { %v1668_v54 = vpop.eup %1667  ;;  %v318_v55 = vadd.f32 1.0, %v1666_v53 }
  0xa5   :  { %v1670_v57 = vpop.eup %1669  ;;  %v209_v58 = vmul.f32 %v1668_v54, %v207_v49  ;;  %vm214_vm2 = vweird.f32 %v1668_v54 }
  0xa6   :  { %v252_v59 = vmul.f32 %v1670_v57, %v250_v50  ;;  %1671 = vrcp.f32 %v318_v55  ;;  %vm257_vm3 = vweird.f32 %v1670_v57  ;;  %vm215_vm6 = vmor %vm213_vm4, %vm214_vm2  ;;  %v330_v38 = vand.u32 2147483648, %v318_v55 }
  0xa7   :  { %v210_v60 = vsub.f32 1.0, %v209_v58  ;;  %1673 = vtanh.f32 %v289_v56  ;;  %vm258_vm8 = vmor %vm256_vm5, %vm257_vm3  ;;  %vm324_vm11 = vweird.f32 %v318_v55  ;;  %v328_v40 = vand.u32 2147483647, %v318_v55 }
  0xa8   :  { %v253_v61 = vsub.f32 1.0, %v252_v59  ;;  %v331_v42 = vor.u32 1.1754944e-38, %v330_v38 }
  0xa9   :  { %v211_v0 = vmul.f32 %v1668_v54, %v210_v60  ;;  %vm329_vm13 = vcmp.eq.f32.partialorder %v328_v40, 8.507059e+37 }
  0xaa   :  { %v254_v2 = vmul.f32 %v1670_v57, %v253_v61 }
  0xab   :  { %v212_v4 = vadd.f32 %v1668_v54, %v211_v0 }
  0xac   :  { %v1672_v12 = vpop.eup %1671  ;;  %v255_v19 = vadd.f32 %v1670_v57, %v254_v2 }
  0xad   :  { %v320_v21 = vmul.f32 %v1672_v12, %v318_v55  ;;  %v216_v22 = vsel %vm215_vm6, %v1668_v54, %v212_v4  ;;  %v1674_v23 = vpop.eup %1673  ;;  %vm325_vm10 = vweird.f32 %v1672_v12 }
  0xae   :  { %v221_v24 = vsel %vm218_vm7, %v220_v18, %v216_v22  ;;  %v259_v25 = vsel %vm258_vm8, %v1670_v57, %v255_v19  ;;  %vm326_vm12 = vmor %vm324_vm11, %vm325_vm10 }
  0xaf   :  { %v321_v27 = vsub.f32 1.0, %v320_v21  ;;  %v264_v30 = vsel %vm261_vm9, %v263_v20, %v259_v25  ;;  %v335_v32 = vmul.f32 %v1674_v23, %v221_v24 }
  0xb0   :  { %v334_v33 = vmul.f32 0.0, %v264_v30 }
  0xb1   :  { %v322_v34 = vmul.f32 %v1672_v12, %v321_v27 }
  0xb2   :  { %v2058_v36 = vadd.f32 %v335_v32, %v334_v33 }
  0xb3   :  { %v323_v37 = vadd.f32 %v1672_v12, %v322_v34 }
  0xb4   :  { %1675 = vtanh.f32 %v2058_v36 }
  0xb5   :  { %v327_v41 = vsel %vm326_vm12, %v1672_v12, %v323_v37 }
  0xb6   :  { %v332_v45 = vsel %vm329_vm13, %v331_v42, %v327_v41  ;;  %v499_v41 = vrot.slane %v2058_v36, 6  ;;  %vm507_vm13 = vcmask 158722  }
  0xba   :  { %v1676_v44 = vpop.eup %1675 }
  0xbb   :  { %v338_v46 = vmul.f32 %v1676_v44, %v332_v45 }
  0xbd   :  { %340 = vst.msk [vmem:[#allocation2] sm:$0x3] %vm339_vm15, %v338_v46  ;;  %1576 = vmatmul.msk.f32.vlgmr.msra.gmra.mxu0 %vm176_vm14, %v338_v46  ;;  %1579 = vmatmul.msk.f32.vlgmr.msra.gmra.mxu1 %vm176_vm14, %v338_v46 }
  0xbe   :  { %1582 = vmatmul.msk.f32.vlgmr.msra.gmra.mxu2 %vm176_vm14, %v338_v46  ;;  %1584 = vmatmul.msk.f32.vlgmr.msra.gmra.mxu3 %vm176_vm14, %v338_v46 }
  0xbf   :  { %1597 = vmatpush.msk.msra.mxu0 %vm35_vm0, %v1910_v5  ;;  %1600 = vmatpush.msk.msra.mxu1 %vm35_vm0, %v1915_v6 }
  0xc0   :  { %1603 = vmatpush.msk.msra.mxu2 %vm35_vm0, %v1945_v11  ;;  %1605 = vmatpush.msk.msra.mxu3 %vm35_vm0, %v1922_v7 }
  0xc1   :  { %696 = vmatpush.msra.mxu0 %v1927_v8  ;;  %739 = vmatpush.msra.mxu1 %v1935_v9 }
  0xc2   :  { %782 = vmatpush.msra.mxu2 %v1966_v15  ;;  %807 = vmatpush.msra.mxu3 %v1961_v14 }
  0xc3   :  { %697 = vmatpush.msra.mxu0 %v1940_v10  ;;  %740 = vmatpush.msra.mxu1 %v1956_v13 }
  0xc4   :  { %783 = vmatpush.msra.mxu2 %v1984_v17  ;;  %808 = vmatpush.msra.mxu3 %v1974_v16 }
 0x13a   :  { %v361_v47 = vpop.f32.mrf.mxu0  ;;  %v404_v48 = vpop.f32.mrf.mxu1 }
 0x13b   :  { %v365_v49 = vrot.slane %v361_v47, 6  ;;  %v408_v50 = vrot.slane %v404_v48, 6 }
 0x13d   :  { %v367_v52 = vadd.f32 %v365_v49, %v2036_v29  ;;  %v410_v53 = vadd.f32 %v408_v50, %v2041_v31 }
 0x13f   :  { %v1577_v54 = vmul.f32 -1.442695, %v367_v52  ;;  %v1580_v55 = vmul.f32 -1.442695, %v410_v53 }
 0x141   :  { %1677 = vpow2.f32 %v1577_v54  ;;  %v472_v56 = vpop.f32.mrf.mxu3  ;;  %v447_v0 = vpop.f32.mrf.mxu2 }
 0x142   :  { %1679 = vpow2.f32 %v1580_v55  ;;  %v476_v57 = vrot.slane %v472_v56, 6  ;;  %v451_v1 = vrot.slane %v447_v0, 6 }
 0x144   :  { %v478_v58 = vadd.f32 %v476_v57, %v2052_v43  ;;  %v453_v12 = vadd.f32 %v451_v1, %v2055_v51 }
 0x146   :  { %v1585_v59 = vmul.f32 -1.442695, %v478_v58 }
 0x147   :  { %v1678_v60 = vpop.eup %1677 }
 0x148   :  { %v1680_v61 = vpop.eup %1679  ;;  %v371_v62 = vadd.f32 1.0, %v1678_v60  ;;  %1681 = vpow2.f32 %v1585_v59 }
 0x149   :  { %v414_v63 = vadd.f32 1.0, %v1680_v61 }
 0x14a   :  { %1683 = vrcp.f32 %v371_v62  ;;  %v383_v23 = vand.u32 2147483648, %v371_v62  ;;  %v381_v27 = vand.u32 2147483647, %v371_v62  ;;  %vm377_vm3 = vweird.f32 %v371_v62 }
 0x14b   :  { %1685 = vrcp.f32 %v414_v63  ;;  %v426_v24 = vand.u32 2147483648, %v414_v63  ;;  %v424_v32 = vand.u32 2147483647, %v414_v63  ;;  %vm420_vm4 = vweird.f32 %v414_v63 }
 0x14c   :  { %v384_v37 = vor.u32 1.1754944e-38, %v383_v23  ;;  %vm382_vm7 = vcmp.eq.f32.partialorder %v381_v27, 8.507059e+37 }
 0x14d   :  { %v427_v42 = vor.u32 1.1754944e-38, %v426_v24  ;;  %vm425_vm8 = vcmp.eq.f32.partialorder %v424_v32, 8.507059e+37 }
 0x14e   :  { %v1682_v2 = vpop.eup %1681 }
 0x14f   :  { %v482_v3 = vadd.f32 1.0, %v1682_v2 }
 0x150   :  { %v1684_v4 = vpop.eup %1683 }
 0x151   :  { %v1686_v18 = vpop.eup %1685  ;;  %v373_v19 = vmul.f32 %v1684_v4, %v371_v62  ;;  %1687 = vrcp.f32 %v482_v3  ;;  %vm378_vm1 = vweird.f32 %v1684_v4  ;;  %v494_v36 = vand.u32 2147483648, %v482_v3 }
 0x152   :  { %v416_v20 = vmul.f32 %v1686_v18, %v414_v63  ;;  %1689 = vtanh.f32 %v453_v12  ;;  %vm421_vm2 = vweird.f32 %v1686_v18  ;;  %vm379_vm5 = vmor %vm377_vm3, %vm378_vm1  ;;  %vm488_vm10 = vweird.f32 %v482_v3 }
 0x153   :  { %v374_v21 = vsub.f32 1.0, %v373_v19  ;;  %vm422_vm6 = vmor %vm420_vm4, %vm421_vm2  ;;  %v492_v56 = vand.u32 2147483647, %v482_v3  ;;  %v495_v58 = vor.u32 1.1754944e-38, %v494_v36 }
 0x154   :  { %v417_v22 = vsub.f32 1.0, %v416_v20 }
 0x155   :  { %v375_v25 = vmul.f32 %v1684_v4, %v374_v21  ;;  %vm493_vm12 = vcmp.eq.f32.partialorder %v492_v56, 8.507059e+37 }
 0x156   :  { %v418_v30 = vmul.f32 %v1686_v18, %v417_v22 }
 0x157   :  { %v1688_v33 = vpop.eup %1687  ;;  %v376_v34 = vadd.f32 %v1684_v4, %v375_v25 }
 0x158   :  { %v419_v38 = vadd.f32 %v1686_v18, %v418_v30  ;;  %v484_v40 = vmul.f32 %v1688_v33, %v482_v3  ;;  %v1690_v45 = vpop.eup %1689  ;;  %vm489_vm9 = vweird.f32 %v1688_v33 }
 0x159   :  { %v380_v44 = vsel %vm379_vm5, %v1684_v4, %v376_v34  ;;  %vm490_vm11 = vmor %vm488_vm10, %vm489_vm9 }
 0x15a   :  { %v385_v46 = vsel %vm382_vm7, %v384_v37, %v380_v44  ;;  %v423_v47 = vsel %vm422_vm6, %v1686_v18, %v419_v38  ;;  %v485_v48 = vsub.f32 1.0, %v484_v40 }
 0x15b   :  { %v428_v49 = vsel %vm425_vm8, %v427_v42, %v423_v47  ;;  %v502_v50 = vmul.f32 %v1690_v45, %v385_v46 }
 0x15c   :  { %v501_v52 = vmul.f32 %v499_v41, %v428_v49  ;;  %v486_v53 = vmul.f32 %v1688_v33, %v485_v48 }
 0x15e   :  { %v2087_v54 = vadd.f32 %v502_v50, %v501_v52  ;;  %v487_v55 = vadd.f32 %v1688_v33, %v486_v53 }
 0x160   :  { %1691 = vtanh.f32 %v2087_v54  ;;  %v491_v57 = vsel %vm490_vm11, %v1688_v33, %v487_v55 }
 0x161   :  { %v496_v60 = vsel %vm493_vm12, %v495_v58, %v491_v57  ;;  %v668_v58 = vrot.slane %v2087_v54, 6 }
 0x166   :  { %v1692_v59 = vpop.eup %1691 }
 0x167   :  { %v505_v61 = vmul.f32 %v1692_v59, %v496_v60 }
 0x169   :  { %508 = vst.msk [vmem:[#allocation2] sm:$0xc] %vm507_vm13, %v505_v61  ;;  %v510_v62 = vrot.slane %v505_v61, 2 }
 0x16b   :  { %1587 = vmatmul.msk.f32.vlgmr.msrb.gmra.mxu0 %vm176_vm14, %v510_v62  ;;  %1590 = vmatmul.msk.f32.vlgmr.msrb.gmra.mxu1 %vm176_vm14, %v510_v62 }
 0x16c   :  { %1593 = vmatmul.msk.f32.vlgmr.msrb.gmra.mxu2 %vm176_vm14, %v510_v62  ;;  %1595 = vmatmul.msk.f32.vlgmr.msrb.gmra.mxu3 %vm176_vm14, %v510_v62 }
 0x16d   :  { %1608 = vmatpush.msk.msrb.mxu0 %vm35_vm0, %v1910_v5  ;;  %1611 = vmatpush.msk.msrb.mxu1 %vm35_vm0, %v1915_v6 }
 0x16e   :  { %1614 = vmatpush.msk.msrb.mxu2 %vm35_vm0, %v1945_v11  ;;  %1616 = vmatpush.msk.msrb.mxu3 %vm35_vm0, %v1922_v7 }
 0x16f   :  { %865 = vmatpush.msrb.mxu0 %v1927_v8  ;;  %905 = vmatpush.msrb.mxu1 %v1935_v9 }
 0x170   :  { %945 = vmatpush.msrb.mxu2 %v1966_v15  ;;  %967 = vmatpush.msrb.mxu3 %v1961_v14 }
 0x171   :  { %866 = vmatpush.msrb.mxu0 %v1940_v10  ;;  %906 = vmatpush.msrb.mxu1 %v1956_v13 }
 0x172   :  { %946 = vmatpush.msrb.mxu2 %v1984_v17  ;;  %968 = vmatpush.msrb.mxu3 %v1974_v16 }
 0x1e8   :  { %v530_v63 = vpop.f32.mrf.mxu0  ;;  %v573_v0 = vpop.f32.mrf.mxu1 }
 0x1e9   :  { %v534_v1 = vrot.slane %v530_v63, 4  ;;  %v577_v2 = vrot.slane %v573_v0, 4 }
 0x1eb   :  { %v536_v3 = vadd.f32 %v534_v1, %v2036_v29  ;;  %v579_v4 = vadd.f32 %v577_v2, %v2041_v31 }
 0x1ed   :  { %v1588_v12 = vmul.f32 -1.442695, %v536_v3  ;;  %v1591_v18 = vmul.f32 -1.442695, %v579_v4 }
 0x1ef   :  { %1693 = vpow2.f32 %v1588_v12  ;;  %v641_v19 = vpop.f32.mrf.mxu3  ;;  %v616_v30 = vpop.f32.mrf.mxu2 }
 0x1f0   :  { %1695 = vpow2.f32 %v1591_v18  ;;  %v645_v20 = vrot.slane %v641_v19, 4  ;;  %v620_v32 = vrot.slane %v616_v30, 4 }
 0x1f2   :  { %v647_v21 = vadd.f32 %v645_v20, %v2052_v43  ;;  %v622_v38 = vadd.f32 %v620_v32, %v2055_v51 }
 0x1f4   :  { %v1596_v22 = vmul.f32 -1.442695, %v647_v21 }
 0x1f5   :  { %v1694_v23 = vpop.eup %1693 }
 0x1f6   :  { %v1696_v24 = vpop.eup %1695  ;;  %v540_v25 = vadd.f32 1.0, %v1694_v23  ;;  %1697 = vpow2.f32 %v1596_v22 }
 0x1f7   :  { %v583_v27 = vadd.f32 1.0, %v1696_v24 }
 0x1f8   :  { %1699 = vrcp.f32 %v540_v25  ;;  %v552_v46 = vand.u32 2147483648, %v540_v25  ;;  %v550_v49 = vand.u32 2147483647, %v540_v25  ;;  %vm546_vm3 = vweird.f32 %v540_v25 }
 0x1f9   :  { %1701 = vrcp.f32 %v583_v27  ;;  %v595_v47 = vand.u32 2147483648, %v583_v27  ;;  %v593_v52 = vand.u32 2147483647, %v583_v27  ;;  %vm589_vm4 = vweird.f32 %v583_v27 }
 0x1fa   :  { %v553_v36 = vor.u32 1.1754944e-38, %v552_v46  ;;  %vm551_vm7 = vcmp.eq.f32.partialorder %v550_v49, 8.507059e+37 }
 0x1fb   :  { %v596_v59 = vor.u32 1.1754944e-38, %v595_v47  ;;  %vm594_vm8 = vcmp.eq.f32.partialorder %v593_v52, 8.507059e+37 }
 0x1fc   :  { %v1698_v33 = vpop.eup %1697 }
 0x1fd   :  { %v651_v34 = vadd.f32 1.0, %v1698_v33 }
 0x1fe   :  { %v1700_v37 = vpop.eup %1699 }
 0x1ff   :  { %v1702_v40 = vpop.eup %1701  ;;  %v542_v41 = vmul.f32 %v1700_v37, %v540_v25  ;;  %1703 = vrcp.f32 %v651_v34  ;;  %vm547_vm1 = vweird.f32 %v1700_v37  ;;  %v663_v54 = vand.u32 2147483648, %v651_v34 }
 0x200   :  { %v585_v42 = vmul.f32 %v1702_v40, %v583_v27  ;;  %1705 = vtanh.f32 %v622_v38  ;;  %vm590_vm2 = vweird.f32 %v1702_v40  ;;  %vm548_vm5 = vmor %vm546_vm3, %vm547_vm1  ;;  %vm657_vm10 = vweird.f32 %v651_v34 }
 0x201   :  { %v543_v44 = vsub.f32 1.0, %v542_v41  ;;  %vm591_vm6 = vmor %vm589_vm4, %vm590_vm2  ;;  %v661_v19 = vand.u32 2147483647, %v651_v34  ;;  %v664_v21 = vor.u32 1.1754944e-38, %v663_v54  ;;  %vm676_vm1 = vcmask 160772  }
 0x202   :  { %v586_v45 = vsub.f32 1.0, %v585_v42 }
 0x203   :  { %v544_v48 = vmul.f32 %v1700_v37, %v543_v44  ;;  %vm662_vm12 = vcmp.eq.f32.partialorder %v661_v19, 8.507059e+37 }
 0x204   :  { %v587_v50 = vmul.f32 %v1702_v40, %v586_v45 }
 0x205   :  { %v1704_v53 = vpop.eup %1703  ;;  %v545_v55 = vadd.f32 %v1700_v37, %v544_v48 }
 0x206   :  { %v588_v56 = vadd.f32 %v1702_v40, %v587_v50  ;;  %v653_v57 = vmul.f32 %v1704_v53, %v651_v34  ;;  %v1706_v61 = vpop.eup %1705  ;;  %vm658_vm9 = vweird.f32 %v1704_v53 }
 0x207   :  { %v549_v60 = vsel %vm548_vm5, %v1700_v37, %v545_v55  ;;  %vm659_vm11 = vmor %vm657_vm10, %vm658_vm9 }
 0x208   :  { %v554_v62 = vsel %vm551_vm7, %v553_v36, %v549_v60  ;;  %v592_v63 = vsel %vm591_vm6, %v1702_v40, %v588_v56  ;;  %v654_v0 = vsub.f32 1.0, %v653_v57 }
 0x209   :  { %v597_v1 = vsel %vm594_vm8, %v596_v59, %v592_v63  ;;  %v671_v2 = vmul.f32 %v1706_v61, %v554_v62 }
 0x20a   :  { %v670_v3 = vmul.f32 %v668_v58, %v597_v1  ;;  %v655_v4 = vmul.f32 %v1704_v53, %v654_v0 }
 0x20c   :  { %v2116_v12 = vadd.f32 %v671_v2, %v670_v3  ;;  %v656_v18 = vadd.f32 %v1704_v53, %v655_v4 }
 0x20e   :  { %1707 = vtanh.f32 %v2116_v12  ;;  %v660_v20 = vsel %vm659_vm11, %v1704_v53, %v656_v18  ;;  %v837_v18 = vrot.slane %v2116_v12, 6 }
 0x20f   :  { %v665_v23 = vsel %vm662_vm12, %v664_v21, %v660_v20 }
 0x214   :  { %v1708_v22 = vpop.eup %1707 }
 0x215   :  { %v674_v24 = vmul.f32 %v1708_v22, %v665_v23 }
 0x217   :  { %677 = vst.msk [vmem:[#allocation2] sm:$0x30] %vm676_vm1, %v674_v24  ;;  %v679_v25 = vrot.slane %v674_v24, 4 }
 0x219   :  { %1598 = vmatmul.msk.f32.vlgmr.msra.gmra.mxu0 %vm176_vm14, %v679_v25  ;;  %1601 = vmatmul.msk.f32.vlgmr.msra.gmra.mxu1 %vm176_vm14, %v679_v25 }
 0x21a   :  { %1604 = vmatmul.msk.f32.vlgmr.msra.gmra.mxu2 %vm176_vm14, %v679_v25  ;;  %1606 = vmatmul.msk.f32.vlgmr.msra.gmra.mxu3 %vm176_vm14, %v679_v25 }
 0x21b   :  { %1619 = vmatpush.msk.msra.mxu0 %vm35_vm0, %v1910_v5  ;;  %1622 = vmatpush.msk.msra.mxu1 %vm35_vm0, %v1915_v6 }
 0x21c   :  { %1625 = vmatpush.msk.msra.mxu2 %vm35_vm0, %v1945_v11  ;;  %1627 = vmatpush.msk.msra.mxu3 %vm35_vm0, %v1922_v7 }
 0x21d   :  { %1020 = vmatpush.msra.mxu0 %v1927_v8  ;;  %1063 = vmatpush.msra.mxu1 %v1935_v9 }
 0x21e   :  { %1106 = vmatpush.msra.mxu2 %v1966_v15  ;;  %1131 = vmatpush.msra.mxu3 %v1961_v14 }
 0x21f   :  { %1021 = vmatpush.msra.mxu0 %v1940_v10  ;;  %1064 = vmatpush.msra.mxu1 %v1956_v13 }
 0x220   :  { %1107 = vmatpush.msra.mxu2 %v1984_v17  ;;  %1132 = vmatpush.msra.mxu3 %v1974_v16 }
 0x296   :  { %v699_v27 = vpop.f32.mrf.mxu0  ;;  %v742_v30 = vpop.f32.mrf.mxu1 }
 0x297   :  { %v703_v32 = vrot.slane %v699_v27, 2  ;;  %v746_v33 = vrot.slane %v742_v30, 2 }
 0x299   :  { %v705_v34 = vadd.f32 %v703_v32, %v2036_v29  ;;  %v748_v37 = vadd.f32 %v746_v33, %v2041_v31 }
 0x29b   :  { %v1599_v38 = vmul.f32 -1.442695, %v705_v34  ;;  %v1602_v40 = vmul.f32 -1.442695, %v748_v37 }
 0x29d   :  { %1709 = vpow2.f32 %v1599_v38  ;;  %v810_v41 = vpop.f32.mrf.mxu3  ;;  %v785_v50 = vpop.f32.mrf.mxu2 }
 0x29e   :  { %1711 = vpow2.f32 %v1602_v40  ;;  %v814_v42 = vrot.slane %v810_v41, 2  ;;  %v789_v29 = vrot.slane %v785_v50, 2 }
 0x2a0   :  { %v816_v44 = vadd.f32 %v814_v42, %v2052_v43  ;;  %v791_v55 = vadd.f32 %v789_v29, %v2055_v51 }
 0x2a2   :  { %v1607_v45 = vmul.f32 -1.442695, %v816_v44 }
 0x2a3   :  { %v1710_v46 = vpop.eup %1709 }
 0x2a4   :  { %v1712_v47 = vpop.eup %1711  ;;  %v709_v48 = vadd.f32 1.0, %v1710_v46  ;;  %1713 = vpow2.f32 %v1607_v45 }
 0x2a5   :  { %v752_v49 = vadd.f32 1.0, %v1712_v47 }
 0x2a6   :  { %1715 = vrcp.f32 %v709_v48  ;;  %v721_v59 = vand.u32 2147483648, %v709_v48  ;;  %v719_v62 = vand.u32 2147483647, %v709_v48  ;;  %vm715_vm4 = vweird.f32 %v709_v48 }
 0x2a7   :  { %1717 = vrcp.f32 %v752_v49  ;;  %v764_v60 = vand.u32 2147483648, %v752_v49  ;;  %v762_v0 = vand.u32 2147483647, %v752_v49  ;;  %vm758_vm5 = vweird.f32 %v752_v49 }
 0x2a8   :  { %v722_v51 = vor.u32 1.1754944e-38, %v721_v59  ;;  %vm720_vm8 = vcmp.eq.f32.partialorder %v719_v62, 8.507059e+37 }
 0x2a9   :  { %v765_v54 = vor.u32 1.1754944e-38, %v764_v60  ;;  %vm763_vm9 = vcmp.eq.f32.partialorder %v762_v0, 8.507059e+37 }
 0x2aa   :  { %v1714_v52 = vpop.eup %1713 }
 0x2ab   :  { %v820_v31 = vadd.f32 1.0, %v1714_v52 }
 0x2ac   :  { %v1716_v53 = vpop.eup %1715 }
 0x2ad   :  { %v1718_v36 = vpop.eup %1717  ;;  %v711_v56 = vmul.f32 %v1716_v53, %v709_v48  ;;  %1719 = vrcp.f32 %v820_v31  ;;  %vm716_vm2 = vweird.f32 %v1716_v53  ;;  %v832_v12 = vand.u32 2147483648, %v820_v31 }
 0x2ae   :  { %v754_v57 = vmul.f32 %v1718_v36, %v752_v49  ;;  %1721 = vtanh.f32 %v791_v55  ;;  %vm759_vm3 = vweird.f32 %v1718_v36  ;;  %vm717_vm6 = vmor %vm715_vm4, %vm716_vm2  ;;  %vm826_vm11 = vweird.f32 %v820_v31 }
 0x2af   :  { %v712_v43 = vsub.f32 1.0, %v711_v56  ;;  %vm760_vm7 = vmor %vm758_vm5, %vm759_vm3  ;;  %v830_v34 = vand.u32 2147483647, %v820_v31  ;;  %v833_v38 = vor.u32 1.1754944e-38, %v832_v12  ;;  %vm845_vm3 = vcmask 162822  }
 0x2b0   :  { %v755_v58 = vsub.f32 1.0, %v754_v57 }
 0x2b1   :  { %v713_v61 = vmul.f32 %v1716_v53, %v712_v43  ;;  %vm831_vm2 = vcmp.eq.f32.partialorder %v830_v34, 8.507059e+37 }
 0x2b2   :  { %v756_v63 = vmul.f32 %v1718_v36, %v755_v58 }
 0x2b3   :  { %v1720_v1 = vpop.eup %1719  ;;  %v714_v2 = vadd.f32 %v1716_v53, %v713_v61 }
 0x2b4   :  { %v757_v3 = vadd.f32 %v1718_v36, %v756_v63  ;;  %v822_v4 = vmul.f32 %v1720_v1, %v820_v31  ;;  %v1722_v20 = vpop.eup %1721  ;;  %vm827_vm10 = vweird.f32 %v1720_v1 }
 0x2b5   :  { %v718_v19 = vsel %vm717_vm6, %v1716_v53, %v714_v2  ;;  %vm828_vm12 = vmor %vm826_vm11, %vm827_vm10 }
 0x2b6   :  { %v723_v21 = vsel %vm720_vm8, %v722_v51, %v718_v19  ;;  %v761_v22 = vsel %vm760_vm7, %v1718_v36, %v757_v3  ;;  %v823_v23 = vsub.f32 1.0, %v822_v4 }
 0x2b7   :  { %v766_v24 = vsel %vm763_vm9, %v765_v54, %v761_v22  ;;  %v840_v25 = vmul.f32 %v1722_v20, %v723_v21 }
 0x2b8   :  { %v839_v27 = vmul.f32 %v837_v18, %v766_v24  ;;  %v824_v30 = vmul.f32 %v1720_v1, %v823_v23 }
 0x2ba   :  { %v2145_v32 = vadd.f32 %v840_v25, %v839_v27  ;;  %v825_v33 = vadd.f32 %v1720_v1, %v824_v30 }
 0x2bc   :  { %1723 = vtanh.f32 %v2145_v32  ;;  %v829_v37 = vsel %vm828_vm12, %v1720_v1, %v825_v33  ;;  %v994_v51 = vrot.slane %v2145_v32, 6 }
 0x2bd   :  { %v834_v41 = vsel %vm831_vm2, %v833_v38, %v829_v37  ;;  %v1789_v37 = vld [vmem:[%s2263_s2 + $0x10] sm:$0xf]  ;;  %v1790_v38 = vld [vmem:[%s2263_s2 + $0x28] sm:$0xf] }
 0x2c2   :  { %v1724_v40 = vpop.eup %1723 }
 0x2c3   :  { %v843_v42 = vmul.f32 %v1724_v40, %v834_v41  ;;  %v1791_v40 = vld [vmem:[%s2263_s2 + $0x40] sm:$0xf]  ;;  %v1792_v41 = vld [vmem:[%s2263_s2 + $0x58] sm:$0xf] }
 0x2c5   :  { %846 = vst.msk [vmem:[#allocation2] sm:$0xc0] %vm845_vm3, %v843_v42  ;;  %v848_v44 = vrot.slane %v843_v42, 6  ;;  %v1793_v42 = vld [vmem:[%s2263_s2 + $0x8] sm:$0xff] }
 0x2c7   :  { %1609 = vmatmul.msk.f32.vlgmr.msrb.gmra.mxu0 %vm176_vm14, %v848_v44  ;;  %1612 = vmatmul.msk.f32.vlgmr.msrb.gmra.mxu1 %vm176_vm14, %v848_v44 }
 0x2c8   :  { %1615 = vmatmul.msk.f32.vlgmr.msrb.gmra.mxu2 %vm176_vm14, %v848_v44  ;;  %1617 = vmatmul.msk.f32.vlgmr.msrb.gmra.mxu3 %vm176_vm14, %v848_v44  ;;  %v1794_v44 = vld [vmem:[%s2263_s2 + $0x20] sm:$0xff] }
 0x2c9   :  { %1630 = vmatpush.msk.msrb.mxu0 %vm35_vm0, %v1910_v5  ;;  %1633 = vmatpush.msk.msrb.mxu1 %vm35_vm0, %v1915_v6 }
 0x2ca   :  { %1636 = vmatpush.msk.msrb.mxu2 %vm35_vm0, %v1945_v11  ;;  %1638 = vmatpush.msk.msrb.mxu3 %vm35_vm0, %v1922_v7 }
 0x2cb   :  { %1188 = vmatpush.msrb.mxu0 %v1927_v8  ;;  %1231 = vmatpush.msrb.mxu1 %v1935_v9 }
 0x2cc   :  { %1274 = vmatpush.msrb.mxu2 %v1966_v15  ;;  %1299 = vmatpush.msrb.mxu3 %v1961_v14 }
 0x2cd   :  { %1189 = vmatpush.msrb.mxu0 %v1940_v10  ;;  %1232 = vmatpush.msrb.mxu1 %v1956_v13 }
 0x2ce   :  { %1275 = vmatpush.msrb.mxu2 %v1984_v17  ;;  %1300 = vmatpush.msrb.mxu3 %v1974_v16 }
 0x344   :  { %v868_v5 = vpop.f32.mrf.mxu0  ;;  %v908_v6 = vpop.f32.mrf.mxu1 }
 0x345   :  { %v871_v7 = vadd.f32 %v868_v5, %v2032_v26  ;;  %v911_v8 = vadd.f32 %v908_v6, %v2034_v28  ;;  %v1795_v5 = vld [vmem:[%s2263_s2 + $0x38] sm:$0xff]  ;;  %v1796_v6 = vld [vmem:[%s2263_s2 + $0x50] sm:$0xff] }
 0x347   :  { %v1610_v11 = vmul.f32 -1.442695, %v871_v7  ;;  %v1613_v9 = vmul.f32 -1.442695, %v911_v8  ;;  %v1797_v7 = vld [vmem:[%s2263_s2] sm:$0xff]  ;;  %v1798_v8 = vld [vmem:[%s2263_s2 + $0x18] sm:$0xff] }
 0x349   :  { %1725 = vpow2.f32 %v1610_v11  ;;  %v1799_v11 = vld [vmem:[%s2263_s2 + $0x30] sm:$0xff] }
 0x34a   :  { %1727 = vpow2.f32 %v1613_v9  ;;  %v1800_v9 = vld [vmem:[%s2263_s2 + $0x48] sm:$0xff]  ;;  %s1854_s2 = smov [#allocation4]  }
 0x34b   :  { %v970_v15 = vpop.f32.mrf.mxu3  ;;  %v948_v16 = vpop.f32.mrf.mxu2  ;;  %s1525_s6 = sshll.u32 %s1854_s2, 4  ;;  %s1526_s6 = int_to_ptr.vmem [resolvable:$true] %s1525_s6 }
 0x34c   :  { %v973_v14 = vadd.f32 %v970_v15, %v2046_v35  ;;  %v951_v50 = vadd.f32 %v948_v16, %v2049_v39 }
 0x34e   :  { %v1618_v10 = vmul.f32 -1.442695, %v973_v14 }
 0x34f   :  { %v1726_v45 = vpop.eup %1725 }
 0x350   :  { %v1728_v13 = vpop.eup %1727  ;;  %v875_v46 = vadd.f32 1.0, %v1726_v45  ;;  %1729 = vpow2.f32 %v1618_v10 }
 0x351   :  { %v915_v17 = vadd.f32 1.0, %v1728_v13 }
 0x352   :  { %1731 = vrcp.f32 %v875_v46  ;;  %v887_v36 = vand.u32 2147483648, %v875_v46  ;;  %v885_v43 = vand.u32 2147483647, %v875_v46  ;;  %vm881_vm6 = vweird.f32 %v875_v46 }
 0x353   :  { %1733 = vrcp.f32 %v915_v17  ;;  %v927_v56 = vand.u32 2147483648, %v915_v17  ;;  %v925_v59 = vand.u32 2147483647, %v915_v17  ;;  %vm921_vm7 = vweird.f32 %v915_v17 }
 0x354   :  { %v888_v62 = vor.u32 1.1754944e-38, %v887_v36  ;;  %vm886_vm10 = vcmp.eq.f32.partialorder %v885_v43, 8.507059e+37 }
 0x355   :  { %v928_v1 = vor.u32 1.1754944e-38, %v927_v56  ;;  %vm926_vm11 = vcmp.eq.f32.partialorder %v925_v59, 8.507059e+37 }
 0x356   :  { %v1730_v47 = vpop.eup %1729 }
 0x357   :  { %v977_v48 = vadd.f32 1.0, %v1730_v47 }
 0x358   :  { %v1732_v49 = vpop.eup %1731 }
 0x359   :  { %v1734_v29 = vpop.eup %1733  ;;  %v877_v52 = vmul.f32 %v1732_v49, %v875_v46  ;;  %1735 = vrcp.f32 %v977_v48  ;;  %vm882_vm4 = vweird.f32 %v1732_v49  ;;  %v989_v25 = vand.u32 2147483648, %v977_v48 }
 0x35a   :  { %v917_v31 = vmul.f32 %v1734_v29, %v915_v17  ;;  %1737 = vtanh.f32 %v951_v50  ;;  %vm922_vm5 = vweird.f32 %v1734_v29  ;;  %vm883_vm8 = vmor %vm881_vm6, %vm882_vm4  ;;  %vm983_vm2 = vweird.f32 %v977_v48 }
 0x35b   :  { %v878_v53 = vsub.f32 1.0, %v877_v52  ;;  %vm923_vm9 = vmor %vm921_vm7, %vm922_vm5  ;;  %v987_v27 = vand.u32 2147483647, %v977_v48  ;;  %v990_v32 = vor.u32 1.1754944e-38, %v989_v25 }
 0x35c   :  { %v918_v55 = vsub.f32 1.0, %v917_v31 }
 0x35d   :  { %v879_v57 = vmul.f32 %v1732_v49, %v878_v53  ;;  %vm988_vm5 = vcmp.eq.f32.partialorder %v987_v27, 8.507059e+37 }
 0x35e   :  { %v919_v58 = vmul.f32 %v1734_v29, %v918_v55 }
 0x35f   :  { %v1736_v60 = vpop.eup %1735  ;;  %v880_v61 = vadd.f32 %v1732_v49, %v879_v57 }
 0x360   :  { %v920_v63 = vadd.f32 %v1734_v29, %v919_v58  ;;  %v979_v0 = vmul.f32 %v1736_v60, %v977_v48  ;;  %v1738_v3 = vpop.eup %1737  ;;  %vm984_vm12 = vweird.f32 %v1736_v60 }
 0x361   :  { %v884_v2 = vsel %vm883_vm8, %v1732_v49, %v880_v61  ;;  %vm985_vm4 = vmor %vm983_vm2, %vm984_vm12 }
 0x362   :  { %v889_v4 = vsel %vm886_vm10, %v888_v62, %v884_v2  ;;  %v924_v18 = vsel %vm923_vm9, %v1734_v29, %v920_v63  ;;  %v980_v54 = vsub.f32 1.0, %v979_v0 }
 0x363   :  { %v929_v19 = vsel %vm926_vm11, %v928_v1, %v924_v18  ;;  %v997_v20 = vmul.f32 %v1738_v3, %v889_v4 }
 0x364   :  { %v996_v21 = vmul.f32 %v994_v51, %v929_v19  ;;  %v981_v22 = vmul.f32 %v1736_v60, %v980_v54 }
 0x366   :  { %v2174_v23 = vadd.f32 %v997_v20, %v996_v21  ;;  %v982_v24 = vadd.f32 %v1736_v60, %v981_v22 }
 0x368   :  { %1739 = vtanh.f32 %v2174_v23  ;;  %v986_v30 = vsel %vm985_vm4, %v1736_v60, %v982_v24  ;;  %v1161_v22 = vrot.slane %v2174_v23, 6 }
 0x369   :  { %v991_v12 = vsel %vm988_vm5, %v990_v32, %v986_v30 }
 0x36e   :  { %v1740_v33 = vpop.eup %1739 }
 0x36f   :  { %v1000_v34 = vmul.f32 %v1740_v33, %v991_v12 }
 0x371   :  { %1002 = vst.msk [vmem:[#allocation2 + $0x8] sm:$0x3] %vm339_vm15, %v1000_v34  ;;  %1620 = vmatmul.msk.f32.vlgmr.msra.gmra.mxu0 %vm176_vm14, %v1000_v34  ;;  %1623 = vmatmul.msk.f32.vlgmr.msra.gmra.mxu1 %vm176_vm14, %v1000_v34 }
 0x372   :  { %1626 = vmatmul.msk.f32.vlgmr.msra.gmra.mxu2 %vm176_vm14, %v1000_v34  ;;  %1628 = vmatmul.msk.f32.vlgmr.msra.gmra.mxu3 %vm176_vm14, %v1000_v34 }
 0x373   :  { %1641 = vmatpush.msk.msra.mxu0 %vm35_vm0, %v1789_v37  ;;  %1644 = vmatpush.msk.msra.mxu1 %vm35_vm0, %v1790_v38 }
 0x374   :  { %1647 = vmatpush.msk.msra.mxu2 %vm35_vm0, %v1791_v40  ;;  %1649 = vmatpush.msk.msra.mxu3 %vm35_vm0, %v1792_v41 }
 0x375   :  { %1356 = vmatpush.msra.mxu0 %v1793_v42  ;;  %1399 = vmatpush.msra.mxu1 %v1794_v44 }
 0x376   :  { %1442 = vmatpush.msra.mxu2 %v1795_v5  ;;  %1467 = vmatpush.msra.mxu3 %v1796_v6 }
 0x377   :  { %1357 = vmatpush.msra.mxu0 %v1797_v7  ;;  %1400 = vmatpush.msra.mxu1 %v1798_v8 }
 0x378   :  { %1443 = vmatpush.msra.mxu2 %v1799_v11  ;;  %1468 = vmatpush.msra.mxu3 %v1800_v9 }
 0x3ee   :  { %v1023_v15 = vpop.f32.mrf.mxu0  ;;  %v1066_v14 = vpop.f32.mrf.mxu1 }
 0x3ef   :  { %v1027_v10 = vrot.slane %v1023_v15, 6  ;;  %v1070_v45 = vrot.slane %v1066_v14, 6 }
 0x3f1   :  { %v1029_v13 = vadd.f32 %v1027_v10, %v2032_v26  ;;  %v1072_v46 = vadd.f32 %v1070_v45, %v2034_v28 }
 0x3f3   :  { %v1621_v17 = vmul.f32 -1.442695, %v1029_v13  ;;  %v1624_v16 = vmul.f32 -1.442695, %v1072_v46 }
 0x3f5   :  { %1741 = vpow2.f32 %v1621_v17  ;;  %v1134_v47 = vpop.f32.mrf.mxu3  ;;  %v1109_v55 = vpop.f32.mrf.mxu2 }
 0x3f6   :  { %1743 = vpow2.f32 %v1624_v16  ;;  %v1138_v48 = vrot.slane %v1134_v47, 6  ;;  %v1113_v36 = vrot.slane %v1109_v55, 6 }
 0x3f8   :  { %v1140_v49 = vadd.f32 %v1138_v48, %v2046_v35  ;;  %v1115_v58 = vadd.f32 %v1113_v36, %v2049_v39 }
 0x3fa   :  { %v1629_v50 = vmul.f32 -1.442695, %v1140_v49 }
 0x3fb   :  { %v1742_v29 = vpop.eup %1741 }
 0x3fc   :  { %v1744_v52 = vpop.eup %1743  ;;  %v1033_v31 = vadd.f32 1.0, %v1742_v29  ;;  %1745 = vpow2.f32 %v1629_v50 }
 0x3fd   :  { %v1076_v53 = vadd.f32 1.0, %v1744_v52 }
 0x3fe   :  { %1747 = vrcp.f32 %v1033_v31  ;;  %v1045_v0 = vand.u32 2147483648, %v1033_v31  ;;  %v1043_v51 = vand.u32 2147483647, %v1033_v31  ;;  %vm1039_vm6 = vweird.f32 %v1033_v31 }
 0x3ff   :  { %1749 = vrcp.f32 %v1076_v53  ;;  %v1088_v1 = vand.u32 2147483648, %v1076_v53  ;;  %v1086_v4 = vand.u32 2147483647, %v1076_v53  ;;  %vm1082_vm7 = vweird.f32 %v1076_v53 }
 0x400   :  { %v1046_v19 = vor.u32 1.1754944e-38, %v1045_v0  ;;  %vm1044_vm10 = vcmp.eq.f32.partialorder %v1043_v51, 8.507059e+37 }
 0x401   :  { %v1089_v24 = vor.u32 1.1754944e-38, %v1088_v1  ;;  %vm1087_vm11 = vcmp.eq.f32.partialorder %v1086_v4, 8.507059e+37 }
 0x402   :  { %v1746_v56 = vpop.eup %1745 }
 0x403   :  { %v1144_v57 = vadd.f32 1.0, %v1746_v56 }
 0x404   :  { %v1748_v43 = vpop.eup %1747 }
 0x405   :  { %v1750_v59 = vpop.eup %1749  ;;  %v1035_v60 = vmul.f32 %v1748_v43, %v1033_v31  ;;  %1751 = vrcp.f32 %v1144_v57  ;;  %vm1040_vm0 = vweird.f32 %v1748_v43  ;;  %v1156_v23 = vand.u32 2147483648, %v1144_v57 }
 0x406   :  { %v1078_v61 = vmul.f32 %v1750_v59, %v1076_v53  ;;  %1753 = vtanh.f32 %v1115_v58  ;;  %vm1083_vm15 = vweird.f32 %v1750_v59  ;;  %vm1041_vm8 = vmor %vm1039_vm6, %vm1040_vm0  ;;  %vm1150_vm2 = vweird.f32 %v1144_v57 }
 0x407   :  { %v1036_v62 = vsub.f32 1.0, %v1035_v60  ;;  %vm1084_vm9 = vmor %vm1082_vm7, %vm1083_vm15  ;;  %v1154_v42 = vand.u32 2147483647, %v1144_v57  ;;  %v1157_v5 = vor.u32 1.1754944e-38, %v1156_v23 }
 0x408   :  { %v1079_v63 = vsub.f32 1.0, %v1078_v61 }
 0x409   :  { %v1037_v2 = vmul.f32 %v1748_v43, %v1036_v62  ;;  %vm1155_vm5 = vcmp.eq.f32.partialorder %v1154_v42, 8.507059e+37 }
 0x40a   :  { %v1080_v3 = vmul.f32 %v1750_v59, %v1079_v63 }
 0x40b   :  { %v1752_v18 = vpop.eup %1751  ;;  %v1038_v54 = vadd.f32 %v1748_v43, %v1037_v2 }
 0x40c   :  { %v1081_v20 = vadd.f32 %v1750_v59, %v1080_v3  ;;  %v1146_v21 = vmul.f32 %v1752_v18, %v1144_v57  ;;  %v1754_v27 = vpop.eup %1753  ;;  %vm1151_vm12 = vweird.f32 %v1752_v18 }
 0x40d   :  { %v1042_v25 = vsel %vm1041_vm8, %v1748_v43, %v1038_v54  ;;  %vm1152_vm4 = vmor %vm1150_vm2, %vm1151_vm12 }
 0x40e   :  { %v1047_v30 = vsel %vm1044_vm10, %v1046_v19, %v1042_v25  ;;  %v1085_v32 = vsel %vm1084_vm9, %v1750_v59, %v1081_v20  ;;  %v1147_v33 = vsub.f32 1.0, %v1146_v21 }
 0x40f   :  { %v1090_v12 = vsel %vm1087_vm11, %v1089_v24, %v1085_v32  ;;  %v1164_v34 = vmul.f32 %v1754_v27, %v1047_v30 }
 0x410   :  { %v1163_v37 = vmul.f32 %v1161_v22, %v1090_v12  ;;  %v1148_v38 = vmul.f32 %v1752_v18, %v1147_v33 }
 0x412   :  { %v2227_v40 = vadd.f32 %v1164_v34, %v1163_v37  ;;  %v1149_v41 = vadd.f32 %v1752_v18, %v1148_v38 }
 0x414   :  { %1755 = vtanh.f32 %v2227_v40  ;;  %v1153_v44 = vsel %vm1152_vm4, %v1752_v18, %v1149_v41  ;;  %v1329_v21 = vrot.slane %v2227_v40, 6 }
 0x415   :  { %v1158_v7 = vsel %vm1155_vm5, %v1157_v5, %v1153_v44 }
 0x41a   :  { %v1756_v6 = vpop.eup %1755 }
 0x41b   :  { %v1167_v8 = vmul.f32 %v1756_v6, %v1158_v7 }
 0x41d   :  { %1169 = vst.msk [vmem:[#allocation2 + $0x8] sm:$0xc] %vm507_vm13, %v1167_v8  ;;  %v1171_v11 = vrot.slane %v1167_v8, 2 }
 0x41f   :  { %1631 = vmatmul.msk.f32.vlgmr.msrb.gmra.mxu0 %vm176_vm14, %v1171_v11  ;;  %1634 = vmatmul.msk.f32.vlgmr.msrb.gmra.mxu1 %vm176_vm14, %v1171_v11 }
 0x420   :  { %1637 = vmatmul.msk.f32.vlgmr.msrb.gmra.mxu2 %vm176_vm14, %v1171_v11  ;;  %1639 = vmatmul.msk.f32.vlgmr.msrb.gmra.mxu3 %vm176_vm14, %v1171_v11 }
 0x49c   :  { %v1191_v9 = vpop.f32.mrf.mxu0  ;;  %v1234_v15 = vpop.f32.mrf.mxu1 }
 0x49d   :  { %v1195_v14 = vrot.slane %v1191_v9, 4  ;;  %v1238_v10 = vrot.slane %v1234_v15, 4 }
 0x49f   :  { %v1197_v45 = vadd.f32 %v1195_v14, %v2032_v26  ;;  %v1240_v13 = vadd.f32 %v1238_v10, %v2034_v28 }
 0x4a1   :  { %v1632_v46 = vmul.f32 -1.442695, %v1197_v45  ;;  %v1635_v17 = vmul.f32 -1.442695, %v1240_v13 }
 0x4a3   :  { %1757 = vpow2.f32 %v1632_v46  ;;  %v1302_v16 = vpop.f32.mrf.mxu3  ;;  %v1277_v53 = vpop.f32.mrf.mxu2 }
 0x4a4   :  { %1759 = vpow2.f32 %v1635_v17  ;;  %v1306_v47 = vrot.slane %v1302_v16, 4  ;;  %v1281_v55 = vrot.slane %v1277_v53, 4 }
 0x4a6   :  { %v1308_v48 = vadd.f32 %v1306_v47, %v2046_v35  ;;  %v1283_v43 = vadd.f32 %v1281_v55, %v2049_v39 }
 0x4a8   :  { %v1640_v49 = vmul.f32 -1.442695, %v1308_v48 }
 0x4a9   :  { %v1758_v50 = vpop.eup %1757 }
 0x4aa   :  { %v1760_v29 = vpop.eup %1759  ;;  %v1201_v52 = vadd.f32 1.0, %v1758_v50  ;;  %1761 = vpow2.f32 %v1640_v49 }
 0x4ab   :  { %v1244_v31 = vadd.f32 1.0, %v1760_v29 }
 0x4ac   :  { %1763 = vrcp.f32 %v1201_v52  ;;  %v1213_v63 = vand.u32 2147483648, %v1201_v52  ;;  %v1211_v2 = vand.u32 2147483647, %v1201_v52  ;;  %vm1207_vm15 = vweird.f32 %v1201_v52 }
 0x4ad   :  { %1765 = vrcp.f32 %v1244_v31  ;;  %v1256_v0 = vand.u32 2147483648, %v1244_v31  ;;  %v1254_v3 = vand.u32 2147483647, %v1244_v31  ;;  %vm1250_vm6 = vweird.f32 %v1244_v31 }
 0x4ae   :  { %v1214_v54 = vor.u32 1.1754944e-38, %v1213_v63  ;;  %vm1212_vm9 = vcmp.eq.f32.partialorder %v1211_v2, 8.507059e+37 }
 0x4af   :  { %v1257_v22 = vor.u32 1.1754944e-38, %v1256_v0  ;;  %vm1255_vm10 = vcmp.eq.f32.partialorder %v1254_v3, 8.507059e+37 }
 0x4b0   :  { %v1762_v36 = vpop.eup %1761 }
 0x4b1   :  { %v1312_v56 = vadd.f32 1.0, %v1762_v36 }
 0x4b2   :  { %v1764_v57 = vpop.eup %1763 }
 0x4b3   :  { %v1766_v58 = vpop.eup %1765  ;;  %v1203_v59 = vmul.f32 %v1764_v57, %v1201_v52  ;;  %1767 = vrcp.f32 %v1312_v56  ;;  %vm1208_vm13 = vweird.f32 %v1764_v57  ;;  %v1324_v40 = vand.u32 2147483648, %v1312_v56 }
 0x4b4   :  { %v1246_v60 = vmul.f32 %v1766_v58, %v1244_v31  ;;  %1769 = vtanh.f32 %v1283_v43  ;;  %vm1251_vm0 = vweird.f32 %v1766_v58  ;;  %vm1209_vm7 = vmor %vm1207_vm15, %vm1208_vm13  ;;  %vm1318_vm12 = vweird.f32 %v1312_v56 }
 0x4b5   :  { %v1204_v61 = vsub.f32 1.0, %v1203_v59  ;;  %vm1252_vm8 = vmor %vm1250_vm6, %vm1251_vm0  ;;  %v1322_v23 = vand.u32 2147483647, %v1312_v56  ;;  %v1325_v44 = vor.u32 1.1754944e-38, %v1324_v40 }
 0x4b6   :  { %v1247_v62 = vsub.f32 1.0, %v1246_v60 }
 0x4b7   :  { %v1205_v1 = vmul.f32 %v1764_v57, %v1204_v61  ;;  %vm1323_vm4 = vcmp.eq.f32.partialorder %v1322_v23, 8.507059e+37 }
 0x4b8   :  { %v1248_v51 = vmul.f32 %v1766_v58, %v1247_v62 }
 0x4b9   :  { %v1768_v4 = vpop.eup %1767  ;;  %v1206_v18 = vadd.f32 %v1764_v57, %v1205_v1 }
 0x4ba   :  { %v1249_v19 = vadd.f32 %v1766_v58, %v1248_v51  ;;  %v1314_v20 = vmul.f32 %v1768_v4, %v1312_v56  ;;  %v1770_v25 = vpop.eup %1769  ;;  %vm1319_vm11 = vweird.f32 %v1768_v4 }
 0x4bb   :  { %v1210_v24 = vsel %vm1209_vm7, %v1764_v57, %v1206_v18  ;;  %vm1320_vm2 = vmor %vm1318_vm12, %vm1319_vm11 }
 0x4bc   :  { %v1215_v27 = vsel %vm1212_vm9, %v1214_v54, %v1210_v24  ;;  %v1253_v30 = vsel %vm1252_vm8, %v1766_v58, %v1249_v19  ;;  %v1315_v32 = vsub.f32 1.0, %v1314_v20 }
 0x4bd   :  { %v1258_v33 = vsel %vm1255_vm10, %v1257_v22, %v1253_v30  ;;  %v1332_v12 = vmul.f32 %v1770_v25, %v1215_v27 }
 0x4be   :  { %v1331_v34 = vmul.f32 %v1329_v21, %v1258_v33  ;;  %v1316_v37 = vmul.f32 %v1768_v4, %v1315_v32 }
 0x4c0   :  { %v2240_v38 = vadd.f32 %v1332_v12, %v1331_v34  ;;  %v1317_v41 = vadd.f32 %v1768_v4, %v1316_v37 }
 0x4c2   :  { %1771 = vtanh.f32 %v2240_v38  ;;  %v1321_v42 = vsel %vm1320_vm2, %v1768_v4, %v1317_v41  ;;  %v1497_v4 = vrot.slane %v2240_v38, 6 }
 0x4c3   :  { %v1326_v6 = vsel %vm1323_vm4, %v1325_v44, %v1321_v42 }
 0x4c8   :  { %v1772_v5 = vpop.eup %1771 }
 0x4c9   :  { %v1335_v7 = vmul.f32 %v1772_v5, %v1326_v6 }
 0x4cb   :  { %1337 = vst.msk [vmem:[#allocation2 + $0x8] sm:$0x30] %vm676_vm1, %v1335_v7  ;;  %v1339_v8 = vrot.slane %v1335_v7, 4 }
 0x4cd   :  { %1642 = vmatmul.msk.f32.vlgmr.msra.gmra.mxu0 %vm176_vm14, %v1339_v8  ;;  %1645 = vmatmul.msk.f32.vlgmr.msra.gmra.mxu1 %vm176_vm14, %v1339_v8 }
 0x4ce   :  { %1648 = vmatmul.msk.f32.vlgmr.msra.gmra.mxu2 %vm176_vm14, %v1339_v8  ;;  %1650 = vmatmul.msk.f32.vlgmr.msra.gmra.mxu3 %vm176_vm14, %v1339_v8 }
 0x54a   :  { %v1359_v11 = vpop.f32.mrf.mxu0  ;;  %v1402_v9 = vpop.f32.mrf.mxu1 }
 0x54b   :  { %v1363_v15 = vrot.slane %v1359_v11, 2  ;;  %v1406_v14 = vrot.slane %v1402_v9, 2 }
 0x54d   :  { %v1365_v10 = vadd.f32 %v1363_v15, %v2032_v26  ;;  %v1408_v45 = vadd.f32 %v1406_v14, %v2034_v28 }
 0x54f   :  { %v1643_v13 = vmul.f32 -1.442695, %v1365_v10  ;;  %v1646_v46 = vmul.f32 -1.442695, %v1408_v45 }
 0x551   :  { %1773 = vpow2.f32 %v1643_v13  ;;  %v1470_v17 = vpop.f32.mrf.mxu3  ;;  %v1445_v31 = vpop.f32.mrf.mxu2 }
 0x552   :  { %1775 = vpow2.f32 %v1646_v46  ;;  %v1474_v16 = vrot.slane %v1470_v17, 2  ;;  %v1449_v26 = vrot.slane %v1445_v31, 2 }
 0x554   :  { %v1476_v47 = vadd.f32 %v1474_v16, %v2046_v35  ;;  %v1451_v36 = vadd.f32 %v1449_v26, %v2049_v39 }
 0x556   :  { %v1651_v48 = vmul.f32 -1.442695, %v1476_v47 }
 0x557   :  { %v1774_v49 = vpop.eup %1773 }
 0x558   :  { %v1776_v50 = vpop.eup %1775  ;;  %v1369_v29 = vadd.f32 1.0, %v1774_v49  ;;  %1777 = vpow2.f32 %v1651_v48 }
 0x559   :  { %v1412_v52 = vadd.f32 1.0, %v1776_v50 }
 0x55a   :  { %1779 = vrcp.f32 %v1369_v29  ;;  %v1381_v59 = vand.u32 2147483648, %v1369_v29  ;;  %v1379_v62 = vand.u32 2147483647, %v1369_v29  ;;  %vm1375_vm5 = vweird.f32 %v1369_v29 }
 0x55b   :  { %1781 = vrcp.f32 %v1412_v52  ;;  %v1424_v60 = vand.u32 2147483648, %v1412_v52  ;;  %v1422_v0 = vand.u32 2147483647, %v1412_v52  ;;  %vm1418_vm13 = vweird.f32 %v1412_v52 }
 0x55c   :  { %v1382_v39 = vor.u32 1.1754944e-38, %v1381_v59  ;;  %vm1380_vm6 = vcmp.eq.f32.partialorder %v1379_v62, 8.507059e+37 }
 0x55d   :  { %v1425_v18 = vor.u32 1.1754944e-38, %v1424_v60  ;;  %vm1423_vm7 = vcmp.eq.f32.partialorder %v1422_v0, 8.507059e+37 }
 0x55e   :  { %v1778_v53 = vpop.eup %1777 }
 0x55f   :  { %v1480_v28 = vadd.f32 1.0, %v1778_v53 }
 0x560   :  { %v1780_v55 = vpop.eup %1779 }
 0x561   :  { %v1782_v56 = vpop.eup %1781  ;;  %v1371_v57 = vmul.f32 %v1780_v55, %v1369_v29  ;;  %1783 = vrcp.f32 %v1480_v28  ;;  %vm1376_vm14 = vweird.f32 %v1780_v55  ;;  %v1492_v12 = vand.u32 2147483648, %v1480_v28 }
 0x562   :  { %v1414_v43 = vmul.f32 %v1782_v56, %v1412_v52  ;;  %1785 = vtanh.f32 %v1451_v36  ;;  %vm1419_vm1 = vweird.f32 %v1782_v56  ;;  %vm1377_vm0 = vmor %vm1375_vm5, %vm1376_vm14  ;;  %vm1486_vm9 = vweird.f32 %v1480_v28 }
 0x563   :  { %v1372_v35 = vsub.f32 1.0, %v1371_v57  ;;  %vm1420_vm15 = vmor %vm1418_vm13, %vm1419_vm1  ;;  %v1490_v34 = vand.u32 2147483647, %v1480_v28  ;;  %v1493_v38 = vor.u32 1.1754944e-38, %v1492_v12 }
 0x564   :  { %v1415_v58 = vsub.f32 1.0, %v1414_v43 }
 0x565   :  { %v1373_v61 = vmul.f32 %v1780_v55, %v1372_v35  ;;  %vm1491_vm11 = vcmp.eq.f32.partialorder %v1490_v34, 8.507059e+37 }
 0x566   :  { %v1416_v63 = vmul.f32 %v1782_v56, %v1415_v58 }
 0x567   :  { %v1784_v1 = vpop.eup %1783  ;;  %v1374_v2 = vadd.f32 %v1780_v55, %v1373_v61 }
 0x568   :  { %v1417_v51 = vadd.f32 %v1782_v56, %v1416_v63  ;;  %v1482_v3 = vmul.f32 %v1784_v1, %v1480_v28  ;;  %v1786_v19 = vpop.eup %1785  ;;  %vm1487_vm8 = vweird.f32 %v1784_v1 }
 0x569   :  { %v1378_v54 = vsel %vm1377_vm0, %v1780_v55, %v1374_v2  ;;  %vm1488_vm10 = vmor %vm1486_vm9, %vm1487_vm8 }
 0x56a   :  { %v1383_v20 = vsel %vm1380_vm6, %v1382_v39, %v1378_v54  ;;  %v1421_v21 = vsel %vm1420_vm15, %v1782_v56, %v1417_v51  ;;  %v1483_v22 = vsub.f32 1.0, %v1482_v3 }
 0x56b   :  { %v1426_v24 = vsel %vm1423_vm7, %v1425_v18, %v1421_v21  ;;  %v1500_v25 = vmul.f32 %v1786_v19, %v1383_v20 }
 0x56c   :  { %v1499_v27 = vmul.f32 %v1497_v4, %v1426_v24  ;;  %v1484_v30 = vmul.f32 %v1784_v1, %v1483_v22 }
 0x56e   :  { %v1501_v32 = vadd.f32 %v1500_v25, %v1499_v27  ;;  %v1485_v33 = vadd.f32 %v1784_v1, %v1484_v30 }
 0x570   :  { %1787 = vtanh.f32 %v1501_v32  ;;  %1506 = vst.msk [vmem:[#allocation4 - $0x6] sm:$0xc0] %vm845_vm3, %v1501_v32  ;;  %v1489_v37 = vsel %vm1488_vm10, %v1784_v1, %v1485_v33 }
 0x571   :  { %1530 = dma.vmem_to_hbm [thread:$0]  %s1526_s6, 32, %s1528_s8, [#allocation5]   ;;  %v1494_v40 = vsel %vm1491_vm11, %v1493_v38, %v1489_v37 }
 0x576   :  { %v1788_v41 = vpop.eup %1787 }
 0x577   :  { %v1503_v23 = vmul.f32 %v1788_v41, %v1494_v40 }
 0x579   :  { %1505 = vst.msk [vmem:[#allocation2 + $0x8] sm:$0xc0] %vm845_vm3, %v1503_v23 }
 0x57a   :  { %1519 = dma.vmem_to_hbm [thread:$0]  %s1512_s9, 256, %s1514_s11, [#allocation3], %s1856_s12, %s1856_s12, %s1857_s13  }
 0x57b   :  { %1849 = dma.done.wait [#allocation3], 256  }
 0x57c   :  { %1850 = vsyncadd [#allocation3], 4294967040 }
 0x57d   :  { %1851 = dma.done.wait [#allocation5], 32  }
 0x57e   :  { %1852 = vsyncadd [#allocation5], 4294967264 }
 0x57f   :  { %1539 = vsyncpa [#allocation3], 1 }
 0x580   :  { %1540 = vsyncpa [#allocation5], 1 }

</bundles_post_ra>
